<compile_context>
chip_gen: v7x
topology: tpu7x:2x2x1
jax: 0.10.0
libtpu: 0.0.40
codegen_flags: <defaults>
</compile_context>

<pallas_src>
import functools
import math

import jax
import jax.numpy as jnp
from jax.experimental import pallas as pl
from jax.experimental.pallas import tpu as pltpu

# ---- tiny deterministic RoBERTa-style config (synthetic) -------------------
VOCAB = 100
HIDDEN = 32
NUM_HEADS = 2
HEAD_DIM = HIDDEN // NUM_HEADS
INTERMEDIATE = 64
NUM_LAYERS = 2
MAX_POS = 40
PAD_IDX = 1          # RoBERTa padding_idx
LN_EPS = 1e-5

STACKED_PARAM_NAMES = (
    "wq", "bq", "wk", "bk", "wv", "bv", "wo", "bo",
    "ln1g", "ln1b", "w1", "b1", "w2", "b2", "ln2g", "ln2b",
)


# ---------------------------- kernel helpers --------------------------------
def _layer_norm(x, g, b):
    mu = jnp.mean(x, axis=-1, keepdims=True)
    var = jnp.mean((x - mu) ** 2, axis=-1, keepdims=True)
    return (x - mu) * jax.lax.rsqrt(var + LN_EPS) * g + b


def _gelu(x):
    # TODO(synk): HF RoBERTa uses erf-GELU; tanh approx differs by ~1e-3.
    c = math.sqrt(2.0 / math.pi)
    return 0.5 * x * (1.0 + jnp.tanh(c * (x + 0.044715 * x * x * x)))


def _softmax_last(scores):
    # Max-subtraction keeps the -1e9 additive mask numerically safe.  A fully
    # masked row would give a uniform distribution over masked positions
    # (harmless for CLS extraction).
    scores = scores - jnp.max(scores, axis=-1, keepdims=True)
    p = jnp.exp(scores)
    denom = jnp.sum(p, axis=-1, keepdims=True)
    return p * pl.reciprocal(denom, approx=True)   # EUP, not VALU divide


# ----------------------------- fused Pallas kernel ---------------------------
def fused_encoder_kernel(B, S,
                         x_ref, amask_ref, embg_ref, embb_ref,
                         wq_ref, bq_ref, wk_ref, bk_ref, wv_ref, bv_ref,
                         wo_ref, bo_ref, ln1g_ref, ln1b_ref,
                         w1_ref, b1_ref, w2_ref, b2_ref,
                         ln2g_ref, ln2b_ref, o_ref):
    x = x_ref[...].astype(jnp.float32)          # (B*S, H) — batch folded in
    amask = amask_ref[...]                      # (B, 1, S) additive mask

    # embeddings LayerNorm (fused into the same kernel)
    x = _layer_norm(x, embg_ref[...], embb_ref[...])

    scale = 1.0 / math.sqrt(HEAD_DIM)
    for l in range(NUM_LAYERS):                 # static unroll, weights in VMEM
        wq, bq = wq_ref[l], bq_ref[l]
        wk, bk = wk_ref[l], bk_ref[l]
        wv, bv = wv_ref[l], bv_ref[l]
        wo, bo = wo_ref[l], bo_ref[l]
        ln1g, ln1b = ln1g_ref[l], ln1b_ref[l]
        w1, b1 = w1_ref[l], b1_ref[l]
        w2, b2 = w2_ref[l], b2_ref[l]
        ln2g, ln2b = ln2g_ref[l], ln2b_ref[l]

        q = jnp.dot(x, wq, preferred_element_type=jnp.float32) + bq
        k = jnp.dot(x, wk, preferred_element_type=jnp.float32) + bk
        v = jnp.dot(x, wv, preferred_element_type=jnp.float32) + bv

        ctx_heads = []
        for h in range(NUM_HEADS):              # static 2-iteration head loop
            sl = slice(h * HEAD_DIM, (h + 1) * HEAD_DIM)
            qh = q[:, sl].reshape(B, S, HEAD_DIM)
            kh = k[:, sl].reshape(B, S, HEAD_DIM)
            vh = v[:, sl].reshape(B, S, HEAD_DIM)
            s = jnp.einsum("bqd,bkd->bqk", qh, kh,
                           preferred_element_type=jnp.float32) * scale
            s = s + amask                        # (B, S, S) + (B, 1, S)
            p = _softmax_last(s)
            ch = jnp.einsum("bqk,bkd->bqd", p, vh,
                            preferred_element_type=jnp.float32)
            ctx_heads.append(ch.reshape(B * S, HEAD_DIM))
        ctx = jnp.concatenate(ctx_heads, axis=-1)          # (B*S, H)

        attn = jnp.dot(ctx, wo, preferred_element_type=jnp.float32) + bo
        h1 = _layer_norm(x + attn, ln1g, ln1b)

        ff = jnp.dot(h1, w1, preferred_element_type=jnp.float32) + b1
        ff = _gelu(ff)
        ff = jnp.dot(ff, w2, preferred_element_type=jnp.float32) + b2
        x = _layer_norm(h1 + ff, ln2g, ln2b)

    # Write ONLY the CLS rows (row b*S of each batch element) back to HBM.
    cls = jnp.concatenate([x[b * S:b * S + 1, :] for b in range(B)], axis=0)
    o_ref[...] = cls.astype(o_ref.dtype)


# ------------------------------ wrapper ---------------------------------------
def fused_roberta_encoder(x_emb, amask, emb_ln_g, emb_ln_b, layers):
    B, S, H = x_emb.shape
    x2 = x_emb.reshape(B * S, H)                 # fold batch into sublane dim

    args = [x2, amask, emb_ln_g, emb_ln_b]
    args += [layers[name] for name in STACKED_PARAM_NAMES]

    in_specs = [pl.BlockSpec(a.shape, lambda i, _n=a.ndim: (0,) * _n)
                for a in args]

    # NOTE(v7x): with a single fused block there is nothing to shard across the
    # two TensorCores; for larger batches reintroduce a size-,>=2 "parallel"
    # batch grid axis to use both cores.
    return pl.pallas_call(
        functools.partial(fused_encoder_kernel, B, S),
        out_shape=jax.ShapeDtypeStruct((B, HIDDEN), jnp.float32),
        grid=(1,),
        in_specs=in_specs,
        out_specs=pl.BlockSpec((B, HIDDEN), lambda i: (0, 0)),
        compiler_params=pltpu.CompilerParams(dimension_semantics=("arbitrary",)),
    )(*args)


# ---------------------------- parameter init ---------------------------------
def init_params(key):
    std = 0.02
    ks = jax.random.split(key, 9)
    L = NUM_LAYERS
    params = {
        "word_emb": jax.random.normal(ks[0], (VOCAB, HIDDEN), jnp.float32) * std,
        "pos_emb": jax.random.normal(ks[1], (MAX_POS, HIDDEN), jnp.float32) * std,
        "type_emb": jax.random.normal(ks[2], (1, HIDDEN), jnp.float32) * std,
        "emb_ln_g": jnp.ones((1, HIDDEN), jnp.float32),
        "emb_ln_b": jnp.zeros((1, HIDDEN), jnp.float32),
        # per-layer weights stacked with a leading layer axis
        "layers": {
            "wq": jax.random.normal(ks[3], (L, HIDDEN, HIDDEN), jnp.float32) * std,
            "bq": jnp.zeros((L, 1, HIDDEN), jnp.float32),
            "wk": jax.random.normal(ks[4], (L, HIDDEN, HIDDEN), jnp.float32) * std,
            "bk": jnp.zeros((L, 1, HIDDEN), jnp.float32),
            "wv": jax.random.normal(ks[5], (L, HIDDEN, HIDDEN), jnp.float32) * std,
            "bv": jnp.zeros((L, 1, HIDDEN), jnp.float32),
            "wo": jax.random.normal(ks[6], (L, HIDDEN, HIDDEN), jnp.float32) * std,
            "bo": jnp.zeros((L, 1, HIDDEN), jnp.float32),
            "ln1g": jnp.ones((L, 1, HIDDEN), jnp.float32),
            "ln1b": jnp.zeros((L, 1, HIDDEN), jnp.float32),
            "w1": jax.random.normal(ks[7], (L, HIDDEN, INTERMEDIATE), jnp.float32) * std,
            "b1": jnp.zeros((L, 1, INTERMEDIATE), jnp.float32),
            "w2": jax.random.normal(ks[8], (L, INTERMEDIATE, HIDDEN), jnp.float32) * std,
            "b2": jnp.zeros((L, 1, HIDDEN), jnp.float32),
            "ln2g": jnp.ones((L, 1, HIDDEN), jnp.float32),
            "ln2b": jnp.zeros((L, 1, HIDDEN), jnp.float32),
        },
    }
    return params


# ------------------------------- forward --------------------------------------
def roberta_cls_forward(params, input_ids, attention_mask):
    """Equivalent of RobertaContrastive.forward: returns last_hidden_state[:, 0]."""
    mask_f = attention_mask.astype(jnp.float32)
    # HF RoBERTa builds position ids from non-pad input_ids.
    tok_mask = (input_ids != PAD_IDX).astype(jnp.int32)
    position_ids = (jnp.cumsum(tok_mask, axis=1) * tok_mask + PAD_IDX).astype(jnp.int32)

    # Embedding table gathers stay in plain JAX (tiny XLA gathers); everything
    # downstream (embedding LN + all encoder layers + CLS slice) is one kernel.
    x = (params["word_emb"][input_ids]
         + params["pos_emb"][position_ids]
         + params["type_emb"][jnp.zeros_like(input_ids)])

    amask = ((1.0 - mask_f) * -1e9)[:, None, :]             # (B, 1, S) additive
    # TODO(synk): pretrained roberta-base weights not loaded; synthetic params only.
    return fused_roberta_encoder(x, amask, params["emb_ln_g"], params["emb_ln_b"],
                                 params["layers"])           # (B, HIDDEN) == CLS


# --------------------------------- main ----------------------------------------
if __name__ == "__main__":
    key = jax.random.PRNGKey(0)
    pkey, dkey = jax.random.split(key)
    params = init_params(pkey)

    B, S = 2, 8
    input_ids = jax.random.randint(dkey, (B, S), 2, VOCAB, dtype=jnp.int32)
    attention_mask = jnp.ones((B, S), jnp.int32).at[1, -2:].set(0)

    cls = jax.jit(roberta_cls_forward)(params, input_ids, attention_mask)
    cls = jax.block_until_ready(cls)

    assert cls.shape == (B, HIDDEN), cls.shape
    assert bool(jnp.all(jnp.isfinite(cls)))
    print("KERNEL_OK")
</pallas_src>

<mosaic_0001>
module attributes {stable_mosaic.version = 11 : i64} {
  func.func @fused_encoder_kernel(%arg0: i32, %arg1: memref<16x32xf32, #tpu.memory_space<vmem>>, %arg2: memref<2x1x8xf32, #tpu.memory_space<vmem>>, %arg3: memref<1x32xf32, #tpu.memory_space<vmem>>, %arg4: memref<1x32xf32, #tpu.memory_space<vmem>>, %arg5: memref<2x32x32xf32, #tpu.memory_space<vmem>>, %arg6: memref<2x1x32xf32, #tpu.memory_space<vmem>>, %arg7: memref<2x32x32xf32, #tpu.memory_space<vmem>>, %arg8: memref<2x1x32xf32, #tpu.memory_space<vmem>>, %arg9: memref<2x32x32xf32, #tpu.memory_space<vmem>>, %arg10: memref<2x1x32xf32, #tpu.memory_space<vmem>>, %arg11: memref<2x32x32xf32, #tpu.memory_space<vmem>>, %arg12: memref<2x1x32xf32, #tpu.memory_space<vmem>>, %arg13: memref<2x1x32xf32, #tpu.memory_space<vmem>>, %arg14: memref<2x1x32xf32, #tpu.memory_space<vmem>>, %arg15: memref<2x32x64xf32, #tpu.memory_space<vmem>>, %arg16: memref<2x1x64xf32, #tpu.memory_space<vmem>>, %arg17: memref<2x64x32xf32, #tpu.memory_space<vmem>>, %arg18: memref<2x1x32xf32, #tpu.memory_space<vmem>>, %arg19: memref<2x1x32xf32, #tpu.memory_space<vmem>>, %arg20: memref<2x1x32xf32, #tpu.memory_space<vmem>>, %arg21: memref<2x32xf32, #tpu.memory_space<vmem>>) attributes {dimension_semantics = [#tpu.dimension_semantics<arbitrary>], iteration_bounds = array<i64: 1>, scalar_prefetch = 0 : i64, scratch_operands = 0 : i64, tpu.core_type = #tpu.core_type<tc>, window_params = [{pipeline_mode = #tpu.pipeline_mode<synchronous>, transform_indices = @transform_0, window_bounds = array<i64: 16, 32>}, {pipeline_mode = #tpu.pipeline_mode<synchronous>, transform_indices = @transform_1, window_bounds = array<i64: 2, 1, 8>}, {pipeline_mode = #tpu.pipeline_mode<synchronous>, transform_indices = @transform_2, window_bounds = array<i64: 1, 32>}, {pipeline_mode = #tpu.pipeline_mode<synchronous>, transform_indices = @transform_3, window_bounds = array<i64: 1, 32>}, {pipeline_mode = #tpu.pipeline_mode<synchronous>, transform_indices = @transform_4, window_bounds = array<i64: 2, 32, 32>}, {pipeline_mode = #tpu.pipeline_mode<synchronous>, transform_indices = @transform_5, window_bounds = array<i64: 2, 1, 32>}, {pipeline_mode = #tpu.pipeline_mode<synchronous>, transform_indices = @transform_6, window_bounds = array<i64: 2, 32, 32>}, {pipeline_mode = #tpu.pipeline_mode<synchronous>, transform_indices = @transform_7, window_bounds = array<i64: 2, 1, 32>}, {pipeline_mode = #tpu.pipeline_mode<synchronous>, transform_indices = @transform_8, window_bounds = array<i64: 2, 32, 32>}, {pipeline_mode = #tpu.pipeline_mode<synchronous>, transform_indices = @transform_9, window_bounds = array<i64: 2, 1, 32>}, {pipeline_mode = #tpu.pipeline_mode<synchronous>, transform_indices = @transform_10, window_bounds = array<i64: 2, 32, 32>}, {pipeline_mode = #tpu.pipeline_mode<synchronous>, transform_indices = @transform_11, window_bounds = array<i64: 2, 1, 32>}, {pipeline_mode = #tpu.pipeline_mode<synchronous>, transform_indices = @transform_12, window_bounds = array<i64: 2, 1, 32>}, {pipeline_mode = #tpu.pipeline_mode<synchronous>, transform_indices = @transform_13, window_bounds = array<i64: 2, 1, 32>}, {pipeline_mode = #tpu.pipeline_mode<synchronous>, transform_indices = @transform_14, window_bounds = array<i64: 2, 32, 64>}, {pipeline_mode = #tpu.pipeline_mode<synchronous>, transform_indices = @transform_15, window_bounds = array<i64: 2, 1, 64>}, {pipeline_mode = #tpu.pipeline_mode<synchronous>, transform_indices = @transform_16, window_bounds = array<i64: 2, 64, 32>}, {pipeline_mode = #tpu.pipeline_mode<synchronous>, transform_indices = @transform_17, window_bounds = array<i64: 2, 1, 32>}, {pipeline_mode = #tpu.pipeline_mode<synchronous>, transform_indices = @transform_18, window_bounds = array<i64: 2, 1, 32>}, {pipeline_mode = #tpu.pipeline_mode<synchronous>, transform_indices = @transform_19, window_bounds = array<i64: 2, 1, 32>}, {pipeline_mode = #tpu.pipeline_mode<synchronous>, transform_indices = @transform_20, window_bounds = array<i64: 2, 32>}]} {
    %c0 = arith.constant 0 : index
    %c0_0 = arith.constant 0 : index
    %0 = vector.load %arg1[%c0, %c0_0] : memref<16x32xf32, #tpu.memory_space<vmem>>, vector<16x32xf32>
    %c0_1 = arith.constant 0 : index
    %c0_2 = arith.constant 0 : index
    %c0_3 = arith.constant 0 : index
    %1 = vector.load %arg2[%c0_1, %c0_2, %c0_3] : memref<2x1x8xf32, #tpu.memory_space<vmem>>, vector<2x1x8xf32>
    %c0_4 = arith.constant 0 : index
    %c0_5 = arith.constant 0 : index
    %2 = vector.load %arg3[%c0_4, %c0_5] : memref<1x32xf32, #tpu.memory_space<vmem>>, vector<1x32xf32>
    %c0_6 = arith.constant 0 : index
    %c0_7 = arith.constant 0 : index
    %3 = vector.load %arg4[%c0_6, %c0_7] : memref<1x32xf32, #tpu.memory_space<vmem>>, vector<1x32xf32>
    %cst = arith.constant dense<0.000000e+00> : vector<16xf32>
    %4 = vector.multi_reduction <add>, %0, %cst [1] : vector<16x32xf32> to vector<16xf32>
    %5 = vector.shape_cast %4 : vector<16xf32> to vector<16x1xf32>
    %cst_8 = arith.constant 3.200000e+01 : f32
    %6 = vector.broadcast %cst_8 : f32 to vector<16x1xf32>
    %7 = arith.divf %5, %6 : vector<16x1xf32>
    %8 = vector.broadcast %7 : vector<16x1xf32> to vector<16x32xf32>
    %9 = arith.subf %0, %8 : vector<16x32xf32>
    %10 = arith.mulf %9, %9 : vector<16x32xf32>
    %cst_9 = arith.constant dense<0.000000e+00> : vector<16xf32>
    %11 = vector.multi_reduction <add>, %10, %cst_9 [1] : vector<16x32xf32> to vector<16xf32>
    %12 = vector.shape_cast %11 : vector<16xf32> to vector<16x1xf32>
    %cst_10 = arith.constant 3.200000e+01 : f32
    %13 = vector.broadcast %cst_10 : f32 to vector<16x1xf32>
    %14 = arith.divf %12, %13 : vector<16x1xf32>
    %15 = vector.broadcast %7 : vector<16x1xf32> to vector<16x32xf32>
    %16 = arith.subf %0, %15 : vector<16x32xf32>
    %cst_11 = arith.constant 9.99999974E-6 : f32
    %17 = vector.broadcast %cst_11 : f32 to vector<16x1xf32>
    %18 = arith.addf %14, %17 : vector<16x1xf32>
    %19 = math.rsqrt %18 : vector<16x1xf32>
    %20 = vector.broadcast %19 : vector<16x1xf32> to vector<16x32xf32>
    %21 = arith.mulf %16, %20 : vector<16x32xf32>
    %22 = vector.broadcast %2 : vector<1x32xf32> to vector<16x32xf32>
    %23 = arith.mulf %21, %22 : vector<16x32xf32>
    %24 = vector.broadcast %3 : vector<1x32xf32> to vector<16x32xf32>
    %25 = arith.addf %23, %24 : vector<16x32xf32>
    %c0_12 = arith.constant 0 : index
    %c0_13 = arith.constant 0 : index
    %c0_14 = arith.constant 0 : index
    %26 = vector.load %arg5[%c0_12, %c0_13, %c0_14] : memref<2x32x32xf32, #tpu.memory_space<vmem>>, vector<1x32x32xf32>
    %27 = vector.shape_cast %26 : vector<1x32x32xf32> to vector<32x32xf32>
    %c0_15 = arith.constant 0 : index
    %c0_16 = arith.constant 0 : index
    %c0_17 = arith.constant 0 : index
    %28 = vector.load %arg6[%c0_15, %c0_16, %c0_17] : memref<2x1x32xf32, #tpu.memory_space<vmem>>, vector<1x1x32xf32>
    %29 = vector.shape_cast %28 : vector<1x1x32xf32> to vector<1x32xf32>
    %c0_18 = arith.constant 0 : index
    %c0_19 = arith.constant 0 : index
    %c0_20 = arith.constant 0 : index
    %30 = vector.load %arg7[%c0_18, %c0_19, %c0_20] : memref<2x32x32xf32, #tpu.memory_space<vmem>>, vector<1x32x32xf32>
    %31 = vector.shape_cast %30 : vector<1x32x32xf32> to vector<32x32xf32>
    %c0_21 = arith.constant 0 : index
    %c0_22 = arith.constant 0 : index
    %c0_23 = arith.constant 0 : index
    %32 = vector.load %arg8[%c0_21, %c0_22, %c0_23] : memref<2x1x32xf32, #tpu.memory_space<vmem>>, vector<1x1x32xf32>
    %33 = vector.shape_cast %32 : vector<1x1x32xf32> to vector<1x32xf32>
    %c0_24 = arith.constant 0 : index
    %c0_25 = arith.constant 0 : index
    %c0_26 = arith.constant 0 : index
    %34 = vector.load %arg9[%c0_24, %c0_25, %c0_26] : memref<2x32x32xf32, #tpu.memory_space<vmem>>, vector<1x32x32xf32>
    %35 = vector.shape_cast %34 : vector<1x32x32xf32> to vector<32x32xf32>
    %c0_27 = arith.constant 0 : index
    %c0_28 = arith.constant 0 : index
    %c0_29 = arith.constant 0 : index
    %36 = vector.load %arg10[%c0_27, %c0_28, %c0_29] : memref<2x1x32xf32, #tpu.memory_space<vmem>>, vector<1x1x32xf32>
    %37 = vector.shape_cast %36 : vector<1x1x32xf32> to vector<1x32xf32>
    %c0_30 = arith.constant 0 : index
    %c0_31 = arith.constant 0 : index
    %c0_32 = arith.constant 0 : index
    %38 = vector.load %arg11[%c0_30, %c0_31, %c0_32] : memref<2x32x32xf32, #tpu.memory_space<vmem>>, vector<1x32x32xf32>
    %39 = vector.shape_cast %38 : vector<1x32x32xf32> to vector<32x32xf32>
    %c0_33 = arith.constant 0 : index
    %c0_34 = arith.constant 0 : index
    %c0_35 = arith.constant 0 : index
    %40 = vector.load %arg12[%c0_33, %c0_34, %c0_35] : memref<2x1x32xf32, #tpu.memory_space<vmem>>, vector<1x1x32xf32>
    %41 = vector.shape_cast %40 : vector<1x1x32xf32> to vector<1x32xf32>
    %c0_36 = arith.constant 0 : index
    %c0_37 = arith.constant 0 : index
    %c0_38 = arith.constant 0 : index
    %42 = vector.load %arg13[%c0_36, %c0_37, %c0_38] : memref<2x1x32xf32, #tpu.memory_space<vmem>>, vector<1x1x32xf32>
    %43 = vector.shape_cast %42 : vector<1x1x32xf32> to vector<1x32xf32>
    %c0_39 = arith.constant 0 : index
    %c0_40 = arith.constant 0 : index
    %c0_41 = arith.constant 0 : index
    %44 = vector.load %arg14[%c0_39, %c0_40, %c0_41] : memref<2x1x32xf32, #tpu.memory_space<vmem>>, vector<1x1x32xf32>
    %45 = vector.shape_cast %44 : vector<1x1x32xf32> to vector<1x32xf32>
    %c0_42 = arith.constant 0 : index
    %c0_43 = arith.constant 0 : index
    %c0_44 = arith.constant 0 : index
    %46 = vector.load %arg15[%c0_42, %c0_43, %c0_44] : memref<2x32x64xf32, #tpu.memory_space<vmem>>, vector<1x32x64xf32>
    %47 = vector.shape_cast %46 : vector<1x32x64xf32> to vector<32x64xf32>
    %c0_45 = arith.constant 0 : index
    %c0_46 = arith.constant 0 : index
    %c0_47 = arith.constant 0 : index
    %48 = vector.load %arg16[%c0_45, %c0_46, %c0_47] : memref<2x1x64xf32, #tpu.memory_space<vmem>>, vector<1x1x64xf32>
    %49 = vector.shape_cast %48 : vector<1x1x64xf32> to vector<1x64xf32>
    %c0_48 = arith.constant 0 : index
    %c0_49 = arith.constant 0 : index
    %c0_50 = arith.constant 0 : index
    %50 = vector.load %arg17[%c0_48, %c0_49, %c0_50] : memref<2x64x32xf32, #tpu.memory_space<vmem>>, vector<1x64x32xf32>
    %51 = vector.shape_cast %50 : vector<1x64x32xf32> to vector<64x32xf32>
    %c0_51 = arith.constant 0 : index
    %c0_52 = arith.constant 0 : index
    %c0_53 = arith.constant 0 : index
    %52 = vector.load %arg18[%c0_51, %c0_52, %c0_53] : memref<2x1x32xf32, #tpu.memory_space<vmem>>, vector<1x1x32xf32>
    %53 = vector.shape_cast %52 : vector<1x1x32xf32> to vector<1x32xf32>
    %c0_54 = arith.constant 0 : index
    %c0_55 = arith.constant 0 : index
    %c0_56 = arith.constant 0 : index
    %54 = vector.load %arg19[%c0_54, %c0_55, %c0_56] : memref<2x1x32xf32, #tpu.memory_space<vmem>>, vector<1x1x32xf32>
    %55 = vector.shape_cast %54 : vector<1x1x32xf32> to vector<1x32xf32>
    %c0_57 = arith.constant 0 : index
    %c0_58 = arith.constant 0 : index
    %c0_59 = arith.constant 0 : index
    %56 = vector.load %arg20[%c0_57, %c0_58, %c0_59] : memref<2x1x32xf32, #tpu.memory_space<vmem>>, vector<1x1x32xf32>
    %57 = vector.shape_cast %56 : vector<1x1x32xf32> to vector<1x32xf32>
    %cst_60 = arith.constant dense<0.000000e+00> : vector<16x32xf32>
    %58 = tpu.matmul %25, %27, %cst_60 {dimension_numbers = #tpu.dot_dimension_numbers<[1], [0], [0], [1], [0, 0, 1, 1], [], []>} : vector<16x32xf32>, vector<32x32xf32>, vector<16x32xf32> -> vector<16x32xf32>
    %59 = vector.broadcast %29 : vector<1x32xf32> to vector<16x32xf32>
    %60 = arith.addf %58, %59 : vector<16x32xf32>
    %cst_61 = arith.constant dense<0.000000e+00> : vector<16x32xf32>
    %61 = tpu.matmul %25, %31, %cst_61 {dimension_numbers = #tpu.dot_dimension_numbers<[1], [0], [0], [1], [0, 0, 1, 1], [], []>} : vector<16x32xf32>, vector<32x32xf32>, vector<16x32xf32> -> vector<16x32xf32>
    %62 = vector.broadcast %33 : vector<1x32xf32> to vector<16x32xf32>
    %63 = arith.addf %61, %62 : vector<16x32xf32>
    %cst_62 = arith.constant dense<0.000000e+00> : vector<16x32xf32>
    %64 = tpu.matmul %25, %35, %cst_62 {dimension_numbers = #tpu.dot_dimension_numbers<[1], [0], [0], [1], [0, 0, 1, 1], [], []>} : vector<16x32xf32>, vector<32x32xf32>, vector<16x32xf32> -> vector<16x32xf32>
    %65 = vector.broadcast %37 : vector<1x32xf32> to vector<16x32xf32>
    %66 = arith.addf %64, %65 : vector<16x32xf32>
    %67 = vector.extract_strided_slice %60 {offsets = [0, 0], sizes = [16, 16], strides = [1, 1]} : vector<16x32xf32> to vector<16x16xf32>
    %68 = vector.shape_cast %67 : vector<16x16xf32> to vector<2x8x16xf32>
    %69 = vector.extract_strided_slice %63 {offsets = [0, 0], sizes = [16, 16], strides = [1, 1]} : vector<16x32xf32> to vector<16x16xf32>
    %70 = vector.shape_cast %69 : vector<16x16xf32> to vector<2x8x16xf32>
    %71 = vector.extract_strided_slice %66 {offsets = [0, 0], sizes = [16, 16], strides = [1, 1]} : vector<16x32xf32> to vector<16x16xf32>
    %72 = vector.shape_cast %71 : vector<16x16xf32> to vector<2x8x16xf32>
    "tpu.trace_start"() <{level = 10 : i32, message = "bqd,bkd->bqk"}> : () -> ()
    %cst_63 = arith.constant dense<0.000000e+00> : vector<2x8x8xf32>
    %73 = tpu.matmul %68, %70, %cst_63 {dimension_numbers = #tpu.dot_dimension_numbers<[2], [2], [1], [1], [0, 0, 0, 1, 1, 1], [0], [0]>} : vector<2x8x16xf32>, vector<2x8x16xf32>, vector<2x8x8xf32> -> vector<2x8x8xf32>
    "tpu.trace_stop"() : () -> ()
    %cst_64 = arith.constant 2.500000e-01 : f32
    %74 = vector.broadcast %cst_64 : f32 to vector<2x8x8xf32>
    %75 = arith.mulf %73, %74 : vector<2x8x8xf32>
    %76 = vector.broadcast %1 : vector<2x1x8xf32> to vector<2x8x8xf32>
    %77 = arith.addf %75, %76 : vector<2x8x8xf32>
    %cst_65 = arith.constant dense<0xFF800000> : vector<2x8xf32>
    %78 = vector.multi_reduction <maximumf>, %77, %cst_65 [2] : vector<2x8x8xf32> to vector<2x8xf32>
    %79 = vector.shape_cast %78 : vector<2x8xf32> to vector<2x8x1xf32>
    %80 = vector.broadcast %79 : vector<2x8x1xf32> to vector<2x8x8xf32>
    %81 = arith.subf %77, %80 : vector<2x8x8xf32>
    %82 = math.exp %81 : vector<2x8x8xf32>
    %cst_66 = arith.constant dense<0.000000e+00> : vector<2x8xf32>
    %83 = vector.multi_reduction <add>, %82, %cst_66 [2] : vector<2x8x8xf32> to vector<2x8xf32>
    %84 = vector.shape_cast %83 : vector<2x8xf32> to vector<2x8x1xf32>
    %85 = tpu.reciprocal %84 {approx = true} : vector<2x8x1xf32> -> vector<2x8x1xf32>
    %86 = vector.broadcast %85 : vector<2x8x1xf32> to vector<2x8x8xf32>
    %87 = arith.mulf %82, %86 : vector<2x8x8xf32>
    "tpu.trace_start"() <{level = 10 : i32, message = "bqk,bkd->bqd"}> : () -> ()
    %cst_67 = arith.constant dense<0.000000e+00> : vector<2x8x16xf32>
    %88 = tpu.matmul %87, %72, %cst_67 {dimension_numbers = #tpu.dot_dimension_numbers<[2], [1], [1], [2], [0, 0, 0, 1, 1, 2], [0], [0]>} : vector<2x8x8xf32>, vector<2x8x16xf32>, vector<2x8x16xf32> -> vector<2x8x16xf32>
    "tpu.trace_stop"() : () -> ()
    %89 = vector.shape_cast %88 : vector<2x8x16xf32> to vector<16x16xf32>
    %90 = vector.extract_strided_slice %60 {offsets = [0, 16], sizes = [16, 16], strides = [1, 1]} : vector<16x32xf32> to vector<16x16xf32>
    %91 = vector.shape_cast %90 : vector<16x16xf32> to vector<2x8x16xf32>
    %92 = vector.extract_strided_slice %63 {offsets = [0, 16], sizes = [16, 16], strides = [1, 1]} : vector<16x32xf32> to vector<16x16xf32>
    %93 = vector.shape_cast %92 : vector<16x16xf32> to vector<2x8x16xf32>
    %94 = vector.extract_strided_slice %66 {offsets = [0, 16], sizes = [16, 16], strides = [1, 1]} : vector<16x32xf32> to vector<16x16xf32>
    %95 = vector.shape_cast %94 : vector<16x16xf32> to vector<2x8x16xf32>
    "tpu.trace_start"() <{level = 10 : i32, message = "bqd,bkd->bqk"}> : () -> ()
    %cst_68 = arith.constant dense<0.000000e+00> : vector<2x8x8xf32>
    %96 = tpu.matmul %91, %93, %cst_68 {dimension_numbers = #tpu.dot_dimension_numbers<[2], [2], [1], [1], [0, 0, 0, 1, 1, 1], [0], [0]>} : vector<2x8x16xf32>, vector<2x8x16xf32>, vector<2x8x8xf32> -> vector<2x8x8xf32>
    "tpu.trace_stop"() : () -> ()
    %cst_69 = arith.constant 2.500000e-01 : f32
    %97 = vector.broadcast %cst_69 : f32 to vector<2x8x8xf32>
    %98 = arith.mulf %96, %97 : vector<2x8x8xf32>
    %99 = vector.broadcast %1 : vector<2x1x8xf32> to vector<2x8x8xf32>
    %100 = arith.addf %98, %99 : vector<2x8x8xf32>
    %cst_70 = arith.constant dense<0xFF800000> : vector<2x8xf32>
    %101 = vector.multi_reduction <maximumf>, %100, %cst_70 [2] : vector<2x8x8xf32> to vector<2x8xf32>
    %102 = vector.shape_cast %101 : vector<2x8xf32> to vector<2x8x1xf32>
    %103 = vector.broadcast %102 : vector<2x8x1xf32> to vector<2x8x8xf32>
    %104 = arith.subf %100, %103 : vector<2x8x8xf32>
    %105 = math.exp %104 : vector<2x8x8xf32>
    %cst_71 = arith.constant dense<0.000000e+00> : vector<2x8xf32>
    %106 = vector.multi_reduction <add>, %105, %cst_71 [2] : vector<2x8x8xf32> to vector<2x8xf32>
    %107 = vector.shape_cast %106 : vector<2x8xf32> to vector<2x8x1xf32>
    %108 = tpu.reciprocal %107 {approx = true} : vector<2x8x1xf32> -> vector<2x8x1xf32>
    %109 = vector.broadcast %108 : vector<2x8x1xf32> to vector<2x8x8xf32>
    %110 = arith.mulf %105, %109 : vector<2x8x8xf32>
    "tpu.trace_start"() <{level = 10 : i32, message = "bqk,bkd->bqd"}> : () -> ()
    %cst_72 = arith.constant dense<0.000000e+00> : vector<2x8x16xf32>
    %111 = tpu.matmul %110, %95, %cst_72 {dimension_numbers = #tpu.dot_dimension_numbers<[2], [1], [1], [2], [0, 0, 0, 1, 1, 2], [0], [0]>} : vector<2x8x8xf32>, vector<2x8x16xf32>, vector<2x8x16xf32> -> vector<2x8x16xf32>
    "tpu.trace_stop"() : () -> ()
    %112 = vector.shape_cast %111 : vector<2x8x16xf32> to vector<16x16xf32>
    %113 = tpu.concatenate %89, %112 in 1 : vector<16x16xf32>, vector<16x16xf32> -> vector<16x32xf32>
    %cst_73 = arith.constant dense<0.000000e+00> : vector<16x32xf32>
    %114 = tpu.matmul %113, %39, %cst_73 {dimension_numbers = #tpu.dot_dimension_numbers<[1], [0], [0], [1], [0, 0, 1, 1], [], []>} : vector<16x32xf32>, vector<32x32xf32>, vector<16x32xf32> -> vector<16x32xf32>
    %115 = vector.broadcast %41 : vector<1x32xf32> to vector<16x32xf32>
    %116 = arith.addf %114, %115 : vector<16x32xf32>
    %117 = arith.addf %25, %116 : vector<16x32xf32>
    %cst_74 = arith.constant dense<0.000000e+00> : vector<16xf32>
    %118 = vector.multi_reduction <add>, %117, %cst_74 [1] : vector<16x32xf32> to vector<16xf32>
    %119 = vector.shape_cast %118 : vector<16xf32> to vector<16x1xf32>
    %cst_75 = arith.constant 3.200000e+01 : f32
    %120 = vector.broadcast %cst_75 : f32 to vector<16x1xf32>
    %121 = arith.divf %119, %120 : vector<16x1xf32>
    %122 = vector.broadcast %121 : vector<16x1xf32> to vector<16x32xf32>
    %123 = arith.subf %117, %122 : vector<16x32xf32>
    %124 = arith.mulf %123, %123 : vector<16x32xf32>
    %cst_76 = arith.constant dense<0.000000e+00> : vector<16xf32>
    %125 = vector.multi_reduction <add>, %124, %cst_76 [1] : vector<16x32xf32> to vector<16xf32>
    %126 = vector.shape_cast %125 : vector<16xf32> to vector<16x1xf32>
    %cst_77 = arith.constant 3.200000e+01 : f32
    %127 = vector.broadcast %cst_77 : f32 to vector<16x1xf32>
    %128 = arith.divf %126, %127 : vector<16x1xf32>
    %129 = vector.broadcast %121 : vector<16x1xf32> to vector<16x32xf32>
    %130 = arith.subf %117, %129 : vector<16x32xf32>
    %cst_78 = arith.constant 9.99999974E-6 : f32
    %131 = vector.broadcast %cst_78 : f32 to vector<16x1xf32>
    %132 = arith.addf %128, %131 : vector<16x1xf32>
    %133 = math.rsqrt %132 : vector<16x1xf32>
    %134 = vector.broadcast %133 : vector<16x1xf32> to vector<16x32xf32>
    %135 = arith.mulf %130, %134 : vector<16x32xf32>
    %136 = vector.broadcast %43 : vector<1x32xf32> to vector<16x32xf32>
    %137 = arith.mulf %135, %136 : vector<16x32xf32>
    %138 = vector.broadcast %45 : vector<1x32xf32> to vector<16x32xf32>
    %139 = arith.addf %137, %138 : vector<16x32xf32>
    %cst_79 = arith.constant dense<0.000000e+00> : vector<16x64xf32>
    %140 = tpu.matmul %139, %47, %cst_79 {dimension_numbers = #tpu.dot_dimension_numbers<[1], [0], [0], [1], [0, 0, 1, 1], [], []>} : vector<16x32xf32>, vector<32x64xf32>, vector<16x64xf32> -> vector<16x64xf32>
    %141 = vector.broadcast %49 : vector<1x64xf32> to vector<16x64xf32>
    %142 = arith.addf %140, %141 : vector<16x64xf32>
    %cst_80 = arith.constant 5.000000e-01 : f32
    %143 = vector.broadcast %cst_80 : f32 to vector<16x64xf32>
    %144 = arith.mulf %143, %142 : vector<16x64xf32>
    %cst_81 = arith.constant 4.471500e-02 : f32
    %145 = vector.broadcast %cst_81 : f32 to vector<16x64xf32>
    %146 = arith.mulf %145, %142 : vector<16x64xf32>
    %147 = arith.mulf %146, %142 : vector<16x64xf32>
    %148 = arith.mulf %147, %142 : vector<16x64xf32>
    %149 = arith.addf %142, %148 : vector<16x64xf32>
    %cst_82 = arith.constant 0.797884583 : f32
    %150 = vector.broadcast %cst_82 : f32 to vector<16x64xf32>
    %151 = arith.mulf %150, %149 : vector<16x64xf32>
    %152 = math.tanh %151 : vector<16x64xf32>
    %cst_83 = arith.constant 1.000000e+00 : f32
    %153 = vector.broadcast %cst_83 : f32 to vector<16x64xf32>
    %154 = arith.addf %153, %152 : vector<16x64xf32>
    %155 = arith.mulf %144, %154 : vector<16x64xf32>
    %cst_84 = arith.constant dense<0.000000e+00> : vector<16x32xf32>
    %156 = tpu.matmul %155, %51, %cst_84 {dimension_numbers = #tpu.dot_dimension_numbers<[1], [0], [0], [1], [0, 0, 1, 1], [], []>} : vector<16x64xf32>, vector<64x32xf32>, vector<16x32xf32> -> vector<16x32xf32>
    %157 = vector.broadcast %53 : vector<1x32xf32> to vector<16x32xf32>
    %158 = arith.addf %156, %157 : vector<16x32xf32>
    %159 = arith.addf %139, %158 : vector<16x32xf32>
    %cst_85 = arith.constant dense<0.000000e+00> : vector<16xf32>
    %160 = vector.multi_reduction <add>, %159, %cst_85 [1] : vector<16x32xf32> to vector<16xf32>
    %161 = vector.shape_cast %160 : vector<16xf32> to vector<16x1xf32>
    %cst_86 = arith.constant 3.200000e+01 : f32
    %162 = vector.broadcast %cst_86 : f32 to vector<16x1xf32>
    %163 = arith.divf %161, %162 : vector<16x1xf32>
    %164 = vector.broadcast %163 : vector<16x1xf32> to vector<16x32xf32>
    %165 = arith.subf %159, %164 : vector<16x32xf32>
    %166 = arith.mulf %165, %165 : vector<16x32xf32>
    %cst_87 = arith.constant dense<0.000000e+00> : vector<16xf32>
    %167 = vector.multi_reduction <add>, %166, %cst_87 [1] : vector<16x32xf32> to vector<16xf32>
    %168 = vector.shape_cast %167 : vector<16xf32> to vector<16x1xf32>
    %cst_88 = arith.constant 3.200000e+01 : f32
    %169 = vector.broadcast %cst_88 : f32 to vector<16x1xf32>
    %170 = arith.divf %168, %169 : vector<16x1xf32>
    %171 = vector.broadcast %163 : vector<16x1xf32> to vector<16x32xf32>
    %172 = arith.subf %159, %171 : vector<16x32xf32>
    %cst_89 = arith.constant 9.99999974E-6 : f32
    %173 = vector.broadcast %cst_89 : f32 to vector<16x1xf32>
    %174 = arith.addf %170, %173 : vector<16x1xf32>
    %175 = math.rsqrt %174 : vector<16x1xf32>
    %176 = vector.broadcast %175 : vector<16x1xf32> to vector<16x32xf32>
    %177 = arith.mulf %172, %176 : vector<16x32xf32>
    %178 = vector.broadcast %55 : vector<1x32xf32> to vector<16x32xf32>
    %179 = arith.mulf %177, %178 : vector<16x32xf32>
    %180 = vector.broadcast %57 : vector<1x32xf32> to vector<16x32xf32>
    %181 = arith.addf %179, %180 : vector<16x32xf32>
    %c1 = arith.constant 1 : index
    %c0_90 = arith.constant 0 : index
    %c0_91 = arith.constant 0 : index
    %182 = vector.load %arg5[%c1, %c0_90, %c0_91] : memref<2x32x32xf32, #tpu.memory_space<vmem>>, vector<1x32x32xf32>
    %183 = vector.shape_cast %182 : vector<1x32x32xf32> to vector<32x32xf32>
    %c1_92 = arith.constant 1 : index
    %c0_93 = arith.constant 0 : index
    %c0_94 = arith.constant 0 : index
    %184 = vector.load %arg6[%c1_92, %c0_93, %c0_94] : memref<2x1x32xf32, #tpu.memory_space<vmem>>, vector<1x1x32xf32>
    %185 = vector.shape_cast %184 : vector<1x1x32xf32> to vector<1x32xf32>
    %c1_95 = arith.constant 1 : index
    %c0_96 = arith.constant 0 : index
    %c0_97 = arith.constant 0 : index
    %186 = vector.load %arg7[%c1_95, %c0_96, %c0_97] : memref<2x32x32xf32, #tpu.memory_space<vmem>>, vector<1x32x32xf32>
    %187 = vector.shape_cast %186 : vector<1x32x32xf32> to vector<32x32xf32>
    %c1_98 = arith.constant 1 : index
    %c0_99 = arith.constant 0 : index
    %c0_100 = arith.constant 0 : index
    %188 = vector.load %arg8[%c1_98, %c0_99, %c0_100] : memref<2x1x32xf32, #tpu.memory_space<vmem>>, vector<1x1x32xf32>
    %189 = vector.shape_cast %188 : vector<1x1x32xf32> to vector<1x32xf32>
    %c1_101 = arith.constant 1 : index
    %c0_102 = arith.constant 0 : index
    %c0_103 = arith.constant 0 : index
    %190 = vector.load %arg9[%c1_101, %c0_102, %c0_103] : memref<2x32x32xf32, #tpu.memory_space<vmem>>, vector<1x32x32xf32>
    %191 = vector.shape_cast %190 : vector<1x32x32xf32> to vector<32x32xf32>
    %c1_104 = arith.constant 1 : index
    %c0_105 = arith.constant 0 : index
    %c0_106 = arith.constant 0 : index
    %192 = vector.load %arg10[%c1_104, %c0_105, %c0_106] : memref<2x1x32xf32, #tpu.memory_space<vmem>>, vector<1x1x32xf32>
    %193 = vector.shape_cast %192 : vector<1x1x32xf32> to vector<1x32xf32>
    %c1_107 = arith.constant 1 : index
    %c0_108 = arith.constant 0 : index
    %c0_109 = arith.constant 0 : index
    %194 = vector.load %arg11[%c1_107, %c0_108, %c0_109] : memref<2x32x32xf32, #tpu.memory_space<vmem>>, vector<1x32x32xf32>
    %195 = vector.shape_cast %194 : vector<1x32x32xf32> to vector<32x32xf32>
    %c1_110 = arith.constant 1 : index
    %c0_111 = arith.constant 0 : index
    %c0_112 = arith.constant 0 : index
    %196 = vector.load %arg12[%c1_110, %c0_111, %c0_112] : memref<2x1x32xf32, #tpu.memory_space<vmem>>, vector<1x1x32xf32>
    %197 = vector.shape_cast %196 : vector<1x1x32xf32> to vector<1x32xf32>
    %c1_113 = arith.constant 1 : index
    %c0_114 = arith.constant 0 : index
    %c0_115 = arith.constant 0 : index
    %198 = vector.load %arg13[%c1_113, %c0_114, %c0_115] : memref<2x1x32xf32, #tpu.memory_space<vmem>>, vector<1x1x32xf32>
    %199 = vector.shape_cast %198 : vector<1x1x32xf32> to vector<1x32xf32>
    %c1_116 = arith.constant 1 : index
    %c0_117 = arith.constant 0 : index
    %c0_118 = arith.constant 0 : index
    %200 = vector.load %arg14[%c1_116, %c0_117, %c0_118] : memref<2x1x32xf32, #tpu.memory_space<vmem>>, vector<1x1x32xf32>
    %201 = vector.shape_cast %200 : vector<1x1x32xf32> to vector<1x32xf32>
    %c1_119 = arith.constant 1 : index
    %c0_120 = arith.constant 0 : index
    %c0_121 = arith.constant 0 : index
    %202 = vector.load %arg15[%c1_119, %c0_120, %c0_121] : memref<2x32x64xf32, #tpu.memory_space<vmem>>, vector<1x32x64xf32>
    %203 = vector.shape_cast %202 : vector<1x32x64xf32> to vector<32x64xf32>
    %c1_122 = arith.constant 1 : index
    %c0_123 = arith.constant 0 : index
    %c0_124 = arith.constant 0 : index
    %204 = vector.load %arg16[%c1_122, %c0_123, %c0_124] : memref<2x1x64xf32, #tpu.memory_space<vmem>>, vector<1x1x64xf32>
    %205 = vector.shape_cast %204 : vector<1x1x64xf32> to vector<1x64xf32>
    %c1_125 = arith.constant 1 : index
    %c0_126 = arith.constant 0 : index
    %c0_127 = arith.constant 0 : index
    %206 = vector.load %arg17[%c1_125, %c0_126, %c0_127] : memref<2x64x32xf32, #tpu.memory_space<vmem>>, vector<1x64x32xf32>
    %207 = vector.shape_cast %206 : vector<1x64x32xf32> to vector<64x32xf32>
    %c1_128 = arith.constant 1 : index
    %c0_129 = arith.constant 0 : index
    %c0_130 = arith.constant 0 : index
    %208 = vector.load %arg18[%c1_128, %c0_129, %c0_130] : memref<2x1x32xf32, #tpu.memory_space<vmem>>, vector<1x1x32xf32>
    %209 = vector.shape_cast %208 : vector<1x1x32xf32> to vector<1x32xf32>
    %c1_131 = arith.constant 1 : index
    %c0_132 = arith.constant 0 : index
    %c0_133 = arith.constant 0 : index
    %210 = vector.load %arg19[%c1_131, %c0_132, %c0_133] : memref<2x1x32xf32, #tpu.memory_space<vmem>>, vector<1x1x32xf32>
    %211 = vector.shape_cast %210 : vector<1x1x32xf32> to vector<1x32xf32>
    %c1_134 = arith.constant 1 : index
    %c0_135 = arith.constant 0 : index
    %c0_136 = arith.constant 0 : index
    %212 = vector.load %arg20[%c1_134, %c0_135, %c0_136] : memref<2x1x32xf32, #tpu.memory_space<vmem>>, vector<1x1x32xf32>
    %213 = vector.shape_cast %212 : vector<1x1x32xf32> to vector<1x32xf32>
    %cst_137 = arith.constant dense<0.000000e+00> : vector<16x32xf32>
    %214 = tpu.matmul %181, %183, %cst_137 {dimension_numbers = #tpu.dot_dimension_numbers<[1], [0], [0], [1], [0, 0, 1, 1], [], []>} : vector<16x32xf32>, vector<32x32xf32>, vector<16x32xf32> -> vector<16x32xf32>
    %215 = vector.broadcast %185 : vector<1x32xf32> to vector<16x32xf32>
    %216 = arith.addf %214, %215 : vector<16x32xf32>
    %cst_138 = arith.constant dense<0.000000e+00> : vector<16x32xf32>
    %217 = tpu.matmul %181, %187, %cst_138 {dimension_numbers = #tpu.dot_dimension_numbers<[1], [0], [0], [1], [0, 0, 1, 1], [], []>} : vector<16x32xf32>, vector<32x32xf32>, vector<16x32xf32> -> vector<16x32xf32>
    %218 = vector.broadcast %189 : vector<1x32xf32> to vector<16x32xf32>
    %219 = arith.addf %217, %218 : vector<16x32xf32>
    %cst_139 = arith.constant dense<0.000000e+00> : vector<16x32xf32>
    %220 = tpu.matmul %181, %191, %cst_139 {dimension_numbers = #tpu.dot_dimension_numbers<[1], [0], [0], [1], [0, 0, 1, 1], [], []>} : vector<16x32xf32>, vector<32x32xf32>, vector<16x32xf32> -> vector<16x32xf32>
    %221 = vector.broadcast %193 : vector<1x32xf32> to vector<16x32xf32>
    %222 = arith.addf %220, %221 : vector<16x32xf32>
    %223 = vector.extract_strided_slice %216 {offsets = [0, 0], sizes = [16, 16], strides = [1, 1]} : vector<16x32xf32> to vector<16x16xf32>
    %224 = vector.shape_cast %223 : vector<16x16xf32> to vector<2x8x16xf32>
    %225 = vector.extract_strided_slice %219 {offsets = [0, 0], sizes = [16, 16], strides = [1, 1]} : vector<16x32xf32> to vector<16x16xf32>
    %226 = vector.shape_cast %225 : vector<16x16xf32> to vector<2x8x16xf32>
    %227 = vector.extract_strided_slice %222 {offsets = [0, 0], sizes = [16, 16], strides = [1, 1]} : vector<16x32xf32> to vector<16x16xf32>
    %228 = vector.shape_cast %227 : vector<16x16xf32> to vector<2x8x16xf32>
    "tpu.trace_start"() <{level = 10 : i32, message = "bqd,bkd->bqk"}> : () -> ()
    %cst_140 = arith.constant dense<0.000000e+00> : vector<2x8x8xf32>
    %229 = tpu.matmul %224, %226, %cst_140 {dimension_numbers = #tpu.dot_dimension_numbers<[2], [2], [1], [1], [0, 0, 0, 1, 1, 1], [0], [0]>} : vector<2x8x16xf32>, vector<2x8x16xf32>, vector<2x8x8xf32> -> vector<2x8x8xf32>
    "tpu.trace_stop"() : () -> ()
    %cst_141 = arith.constant 2.500000e-01 : f32
    %230 = vector.broadcast %cst_141 : f32 to vector<2x8x8xf32>
    %231 = arith.mulf %229, %230 : vector<2x8x8xf32>
    %232 = vector.broadcast %1 : vector<2x1x8xf32> to vector<2x8x8xf32>
    %233 = arith.addf %231, %232 : vector<2x8x8xf32>
    %cst_142 = arith.constant dense<0xFF800000> : vector<2x8xf32>
    %234 = vector.multi_reduction <maximumf>, %233, %cst_142 [2] : vector<2x8x8xf32> to vector<2x8xf32>
    %235 = vector.shape_cast %234 : vector<2x8xf32> to vector<2x8x1xf32>
    %236 = vector.broadcast %235 : vector<2x8x1xf32> to vector<2x8x8xf32>
    %237 = arith.subf %233, %236 : vector<2x8x8xf32>
    %238 = math.exp %237 : vector<2x8x8xf32>
    %cst_143 = arith.constant dense<0.000000e+00> : vector<2x8xf32>
    %239 = vector.multi_reduction <add>, %238, %cst_143 [2] : vector<2x8x8xf32> to vector<2x8xf32>
    %240 = vector.shape_cast %239 : vector<2x8xf32> to vector<2x8x1xf32>
    %241 = tpu.reciprocal %240 {approx = true} : vector<2x8x1xf32> -> vector<2x8x1xf32>
    %242 = vector.broadcast %241 : vector<2x8x1xf32> to vector<2x8x8xf32>
    %243 = arith.mulf %238, %242 : vector<2x8x8xf32>
    "tpu.trace_start"() <{level = 10 : i32, message = "bqk,bkd->bqd"}> : () -> ()
    %cst_144 = arith.constant dense<0.000000e+00> : vector<2x8x16xf32>
    %244 = tpu.matmul %243, %228, %cst_144 {dimension_numbers = #tpu.dot_dimension_numbers<[2], [1], [1], [2], [0, 0, 0, 1, 1, 2], [0], [0]>} : vector<2x8x8xf32>, vector<2x8x16xf32>, vector<2x8x16xf32> -> vector<2x8x16xf32>
    "tpu.trace_stop"() : () -> ()
    %245 = vector.shape_cast %244 : vector<2x8x16xf32> to vector<16x16xf32>
    %246 = vector.extract_strided_slice %216 {offsets = [0, 16], sizes = [16, 16], strides = [1, 1]} : vector<16x32xf32> to vector<16x16xf32>
    %247 = vector.shape_cast %246 : vector<16x16xf32> to vector<2x8x16xf32>
    %248 = vector.extract_strided_slice %219 {offsets = [0, 16], sizes = [16, 16], strides = [1, 1]} : vector<16x32xf32> to vector<16x16xf32>
    %249 = vector.shape_cast %248 : vector<16x16xf32> to vector<2x8x16xf32>
    %250 = vector.extract_strided_slice %222 {offsets = [0, 16], sizes = [16, 16], strides = [1, 1]} : vector<16x32xf32> to vector<16x16xf32>
    %251 = vector.shape_cast %250 : vector<16x16xf32> to vector<2x8x16xf32>
    "tpu.trace_start"() <{level = 10 : i32, message = "bqd,bkd->bqk"}> : () -> ()
    %cst_145 = arith.constant dense<0.000000e+00> : vector<2x8x8xf32>
    %252 = tpu.matmul %247, %249, %cst_145 {dimension_numbers = #tpu.dot_dimension_numbers<[2], [2], [1], [1], [0, 0, 0, 1, 1, 1], [0], [0]>} : vector<2x8x16xf32>, vector<2x8x16xf32>, vector<2x8x8xf32> -> vector<2x8x8xf32>
    "tpu.trace_stop"() : () -> ()
    %cst_146 = arith.constant 2.500000e-01 : f32
    %253 = vector.broadcast %cst_146 : f32 to vector<2x8x8xf32>
    %254 = arith.mulf %252, %253 : vector<2x8x8xf32>
    %255 = vector.broadcast %1 : vector<2x1x8xf32> to vector<2x8x8xf32>
    %256 = arith.addf %254, %255 : vector<2x8x8xf32>
    %cst_147 = arith.constant dense<0xFF800000> : vector<2x8xf32>
    %257 = vector.multi_reduction <maximumf>, %256, %cst_147 [2] : vector<2x8x8xf32> to vector<2x8xf32>
    %258 = vector.shape_cast %257 : vector<2x8xf32> to vector<2x8x1xf32>
    %259 = vector.broadcast %258 : vector<2x8x1xf32> to vector<2x8x8xf32>
    %260 = arith.subf %256, %259 : vector<2x8x8xf32>
    %261 = math.exp %260 : vector<2x8x8xf32>
    %cst_148 = arith.constant dense<0.000000e+00> : vector<2x8xf32>
    %262 = vector.multi_reduction <add>, %261, %cst_148 [2] : vector<2x8x8xf32> to vector<2x8xf32>
    %263 = vector.shape_cast %262 : vector<2x8xf32> to vector<2x8x1xf32>
    %264 = tpu.reciprocal %263 {approx = true} : vector<2x8x1xf32> -> vector<2x8x1xf32>
    %265 = vector.broadcast %264 : vector<2x8x1xf32> to vector<2x8x8xf32>
    %266 = arith.mulf %261, %265 : vector<2x8x8xf32>
    "tpu.trace_start"() <{level = 10 : i32, message = "bqk,bkd->bqd"}> : () -> ()
    %cst_149 = arith.constant dense<0.000000e+00> : vector<2x8x16xf32>
    %267 = tpu.matmul %266, %251, %cst_149 {dimension_numbers = #tpu.dot_dimension_numbers<[2], [1], [1], [2], [0, 0, 0, 1, 1, 2], [0], [0]>} : vector<2x8x8xf32>, vector<2x8x16xf32>, vector<2x8x16xf32> -> vector<2x8x16xf32>
    "tpu.trace_stop"() : () -> ()
    %268 = vector.shape_cast %267 : vector<2x8x16xf32> to vector<16x16xf32>
    %269 = tpu.concatenate %245, %268 in 1 : vector<16x16xf32>, vector<16x16xf32> -> vector<16x32xf32>
    %cst_150 = arith.constant dense<0.000000e+00> : vector<16x32xf32>
    %270 = tpu.matmul %269, %195, %cst_150 {dimension_numbers = #tpu.dot_dimension_numbers<[1], [0], [0], [1], [0, 0, 1, 1], [], []>} : vector<16x32xf32>, vector<32x32xf32>, vector<16x32xf32> -> vector<16x32xf32>
    %271 = vector.broadcast %197 : vector<1x32xf32> to vector<16x32xf32>
    %272 = arith.addf %270, %271 : vector<16x32xf32>
    %273 = arith.addf %181, %272 : vector<16x32xf32>
    %cst_151 = arith.constant dense<0.000000e+00> : vector<16xf32>
    %274 = vector.multi_reduction <add>, %273, %cst_151 [1] : vector<16x32xf32> to vector<16xf32>
    %275 = vector.shape_cast %274 : vector<16xf32> to vector<16x1xf32>
    %cst_152 = arith.constant 3.200000e+01 : f32
    %276 = vector.broadcast %cst_152 : f32 to vector<16x1xf32>
    %277 = arith.divf %275, %276 : vector<16x1xf32>
    %278 = vector.broadcast %277 : vector<16x1xf32> to vector<16x32xf32>
    %279 = arith.subf %273, %278 : vector<16x32xf32>
    %280 = arith.mulf %279, %279 : vector<16x32xf32>
    %cst_153 = arith.constant dense<0.000000e+00> : vector<16xf32>
    %281 = vector.multi_reduction <add>, %280, %cst_153 [1] : vector<16x32xf32> to vector<16xf32>
    %282 = vector.shape_cast %281 : vector<16xf32> to vector<16x1xf32>
    %cst_154 = arith.constant 3.200000e+01 : f32
    %283 = vector.broadcast %cst_154 : f32 to vector<16x1xf32>
    %284 = arith.divf %282, %283 : vector<16x1xf32>
    %285 = vector.broadcast %277 : vector<16x1xf32> to vector<16x32xf32>
    %286 = arith.subf %273, %285 : vector<16x32xf32>
    %cst_155 = arith.constant 9.99999974E-6 : f32
    %287 = vector.broadcast %cst_155 : f32 to vector<16x1xf32>
    %288 = arith.addf %284, %287 : vector<16x1xf32>
    %289 = math.rsqrt %288 : vector<16x1xf32>
    %290 = vector.broadcast %289 : vector<16x1xf32> to vector<16x32xf32>
    %291 = arith.mulf %286, %290 : vector<16x32xf32>
    %292 = vector.broadcast %199 : vector<1x32xf32> to vector<16x32xf32>
    %293 = arith.mulf %291, %292 : vector<16x32xf32>
    %294 = vector.broadcast %201 : vector<1x32xf32> to vector<16x32xf32>
    %295 = arith.addf %293, %294 : vector<16x32xf32>
    %cst_156 = arith.constant dense<0.000000e+00> : vector<16x64xf32>
    %296 = tpu.matmul %295, %203, %cst_156 {dimension_numbers = #tpu.dot_dimension_numbers<[1], [0], [0], [1], [0, 0, 1, 1], [], []>} : vector<16x32xf32>, vector<32x64xf32>, vector<16x64xf32> -> vector<16x64xf32>
    %297 = vector.broadcast %205 : vector<1x64xf32> to vector<16x64xf32>
    %298 = arith.addf %296, %297 : vector<16x64xf32>
    %cst_157 = arith.constant 5.000000e-01 : f32
    %299 = vector.broadcast %cst_157 : f32 to vector<16x64xf32>
    %300 = arith.mulf %299, %298 : vector<16x64xf32>
    %cst_158 = arith.constant 4.471500e-02 : f32
    %301 = vector.broadcast %cst_158 : f32 to vector<16x64xf32>
    %302 = arith.mulf %301, %298 : vector<16x64xf32>
    %303 = arith.mulf %302, %298 : vector<16x64xf32>
    %304 = arith.mulf %303, %298 : vector<16x64xf32>
    %305 = arith.addf %298, %304 : vector<16x64xf32>
    %cst_159 = arith.constant 0.797884583 : f32
    %306 = vector.broadcast %cst_159 : f32 to vector<16x64xf32>
    %307 = arith.mulf %306, %305 : vector<16x64xf32>
    %308 = math.tanh %307 : vector<16x64xf32>
    %cst_160 = arith.constant 1.000000e+00 : f32
    %309 = vector.broadcast %cst_160 : f32 to vector<16x64xf32>
    %310 = arith.addf %309, %308 : vector<16x64xf32>
    %311 = arith.mulf %300, %310 : vector<16x64xf32>
    %cst_161 = arith.constant dense<0.000000e+00> : vector<16x32xf32>
    %312 = tpu.matmul %311, %207, %cst_161 {dimension_numbers = #tpu.dot_dimension_numbers<[1], [0], [0], [1], [0, 0, 1, 1], [], []>} : vector<16x64xf32>, vector<64x32xf32>, vector<16x32xf32> -> vector<16x32xf32>
    %313 = vector.broadcast %209 : vector<1x32xf32> to vector<16x32xf32>
    %314 = arith.addf %312, %313 : vector<16x32xf32>
    %315 = arith.addf %295, %314 : vector<16x32xf32>
    %cst_162 = arith.constant dense<0.000000e+00> : vector<16xf32>
    %316 = vector.multi_reduction <add>, %315, %cst_162 [1] : vector<16x32xf32> to vector<16xf32>
    %317 = vector.shape_cast %316 : vector<16xf32> to vector<16x1xf32>
    %cst_163 = arith.constant 3.200000e+01 : f32
    %318 = vector.broadcast %cst_163 : f32 to vector<16x1xf32>
    %319 = arith.divf %317, %318 : vector<16x1xf32>
    %320 = vector.broadcast %319 : vector<16x1xf32> to vector<16x32xf32>
    %321 = arith.subf %315, %320 : vector<16x32xf32>
    %322 = arith.mulf %321, %321 : vector<16x32xf32>
    %cst_164 = arith.constant dense<0.000000e+00> : vector<16xf32>
    %323 = vector.multi_reduction <add>, %322, %cst_164 [1] : vector<16x32xf32> to vector<16xf32>
    %324 = vector.shape_cast %323 : vector<16xf32> to vector<16x1xf32>
    %cst_165 = arith.constant 3.200000e+01 : f32
    %325 = vector.broadcast %cst_165 : f32 to vector<16x1xf32>
    %326 = arith.divf %324, %325 : vector<16x1xf32>
    %327 = vector.broadcast %319 : vector<16x1xf32> to vector<16x32xf32>
    %328 = arith.subf %315, %327 : vector<16x32xf32>
    %cst_166 = arith.constant 9.99999974E-6 : f32
    %329 = vector.broadcast %cst_166 : f32 to vector<16x1xf32>
    %330 = arith.addf %326, %329 : vector<16x1xf32>
    %331 = math.rsqrt %330 : vector<16x1xf32>
    %332 = vector.broadcast %331 : vector<16x1xf32> to vector<16x32xf32>
    %333 = arith.mulf %328, %332 : vector<16x32xf32>
    %334 = vector.broadcast %211 : vector<1x32xf32> to vector<16x32xf32>
    %335 = arith.mulf %333, %334 : vector<16x32xf32>
    %336 = vector.broadcast %213 : vector<1x32xf32> to vector<16x32xf32>
    %337 = arith.addf %335, %336 : vector<16x32xf32>
    %338 = vector.extract_strided_slice %337 {offsets = [0, 0], sizes = [1, 32], strides = [1, 1]} : vector<16x32xf32> to vector<1x32xf32>
    %339 = vector.extract_strided_slice %337 {offsets = [8, 0], sizes = [1, 32], strides = [1, 1]} : vector<16x32xf32> to vector<1x32xf32>
    %340 = tpu.concatenate %338, %339 in 0 : vector<1x32xf32>, vector<1x32xf32> -> vector<2x32xf32>
    %c0_167 = arith.constant 0 : index
    %c0_168 = arith.constant 0 : index
    %341 = vector.load %arg21[%c0_167, %c0_168] : memref<2x32xf32, #tpu.memory_space<vmem>>, vector<2x32xf32>
    tpu.vector_store %arg21[%c0_167, %c0_168], %340 {strides = array<i32>} : memref<2x32xf32, #tpu.memory_space<vmem>>, vector<2x32xf32>,
    return
  }
  func.func @transform_0(%arg0: i32) -> (i32, i32) {
    %c0_i32 = arith.constant 0 : i32
    %c0_i32_0 = arith.constant 0 : i32
    %c0_i32_1 = arith.constant 0 : i32
    return %c0_i32, %c0_i32_0 : i32, i32
  }
  func.func @transform_1(%arg0: i32) -> (i32, i32, i32) {
    %c0_i32 = arith.constant 0 : i32
    %c0_i32_0 = arith.constant 0 : i32
    %c0_i32_1 = arith.constant 0 : i32
    %c0_i32_2 = arith.constant 0 : i32
    return %c0_i32, %c0_i32_0, %c0_i32_1 : i32, i32, i32
  }
  func.func @transform_2(%arg0: i32) -> (i32, i32) {
    %c0_i32 = arith.constant 0 : i32
    %c0_i32_0 = arith.constant 0 : i32
    %c0_i32_1 = arith.constant 0 : i32
    return %c0_i32, %c0_i32_0 : i32, i32
  }
  func.func @transform_3(%arg0: i32) -> (i32, i32) {
    %c0_i32 = arith.constant 0 : i32
    %c0_i32_0 = arith.constant 0 : i32
    %c0_i32_1 = arith.constant 0 : i32
    return %c0_i32, %c0_i32_0 : i32, i32
  }
  func.func @transform_4(%arg0: i32) -> (i32, i32, i32) {
    %c0_i32 = arith.constant 0 : i32
    %c0_i32_0 = arith.constant 0 : i32
    %c0_i32_1 = arith.constant 0 : i32
    %c0_i32_2 = arith.constant 0 : i32
    return %c0_i32, %c0_i32_0, %c0_i32_1 : i32, i32, i32
  }
  func.func @transform_5(%arg0: i32) -> (i32, i32, i32) {
    %c0_i32 = arith.constant 0 : i32
    %c0_i32_0 = arith.constant 0 : i32
    %c0_i32_1 = arith.constant 0 : i32
    %c0_i32_2 = arith.constant 0 : i32
    return %c0_i32, %c0_i32_0, %c0_i32_1 : i32, i32, i32
  }
  func.func @transform_6(%arg0: i32) -> (i32, i32, i32) {
    %c0_i32 = arith.constant 0 : i32
    %c0_i32_0 = arith.constant 0 : i32
    %c0_i32_1 = arith.constant 0 : i32
    %c0_i32_2 = arith.constant 0 : i32
    return %c0_i32, %c0_i32_0, %c0_i32_1 : i32, i32, i32
  }
  func.func @transform_7(%arg0: i32) -> (i32, i32, i32) {
    %c0_i32 = arith.constant 0 : i32
    %c0_i32_0 = arith.constant 0 : i32
    %c0_i32_1 = arith.constant 0 : i32
    %c0_i32_2 = arith.constant 0 : i32
    return %c0_i32, %c0_i32_0, %c0_i32_1 : i32, i32, i32
  }
  func.func @transform_8(%arg0: i32) -> (i32, i32, i32) {
    %c0_i32 = arith.constant 0 : i32
    %c0_i32_0 = arith.constant 0 : i32
    %c0_i32_1 = arith.constant 0 : i32
    %c0_i32_2 = arith.constant 0 : i32
    return %c0_i32, %c0_i32_0, %c0_i32_1 : i32, i32, i32
  }
  func.func @transform_9(%arg0: i32) -> (i32, i32, i32) {
    %c0_i32 = arith.constant 0 : i32
    %c0_i32_0 = arith.constant 0 : i32
    %c0_i32_1 = arith.constant 0 : i32
    %c0_i32_2 = arith.constant 0 : i32
    return %c0_i32, %c0_i32_0, %c0_i32_1 : i32, i32, i32
  }
  func.func @transform_10(%arg0: i32) -> (i32, i32, i32) {
    %c0_i32 = arith.constant 0 : i32
    %c0_i32_0 = arith.constant 0 : i32
    %c0_i32_1 = arith.constant 0 : i32
    %c0_i32_2 = arith.constant 0 : i32
    return %c0_i32, %c0_i32_0, %c0_i32_1 : i32, i32, i32
  }
  func.func @transform_11(%arg0: i32) -> (i32, i32, i32) {
    %c0_i32 = arith.constant 0 : i32
    %c0_i32_0 = arith.constant 0 : i32
    %c0_i32_1 = arith.constant 0 : i32
    %c0_i32_2 = arith.constant 0 : i32
    return %c0_i32, %c0_i32_0, %c0_i32_1 : i32, i32, i32
  }
  func.func @transform_12(%arg0: i32) -> (i32, i32, i32) {
    %c0_i32 = arith.constant 0 : i32
    %c0_i32_0 = arith.constant 0 : i32
    %c0_i32_1 = arith.constant 0 : i32
    %c0_i32_2 = arith.constant 0 : i32
    return %c0_i32, %c0_i32_0, %c0_i32_1 : i32, i32, i32
  }
  func.func @transform_13(%arg0: i32) -> (i32, i32, i32) {
    %c0_i32 = arith.constant 0 : i32
    %c0_i32_0 = arith.constant 0 : i32
    %c0_i32_1 = arith.constant 0 : i32
    %c0_i32_2 = arith.constant 0 : i32
    return %c0_i32, %c0_i32_0, %c0_i32_1 : i32, i32, i32
  }
  func.func @transform_14(%arg0: i32) -> (i32, i32, i32) {
    %c0_i32 = arith.constant 0 : i32
    %c0_i32_0 = arith.constant 0 : i32
    %c0_i32_1 = arith.constant 0 : i32
    %c0_i32_2 = arith.constant 0 : i32
    return %c0_i32, %c0_i32_0, %c0_i32_1 : i32, i32, i32
  }
  func.func @transform_15(%arg0: i32) -> (i32, i32, i32) {
    %c0_i32 = arith.constant 0 : i32
    %c0_i32_0 = arith.constant 0 : i32
    %c0_i32_1 = arith.constant 0 : i32
    %c0_i32_2 = arith.constant 0 : i32
    return %c0_i32, %c0_i32_0, %c0_i32_1 : i32, i32, i32
  }
  func.func @transform_16(%arg0: i32) -> (i32, i32, i32) {
    %c0_i32 = arith.constant 0 : i32
    %c0_i32_0 = arith.constant 0 : i32
    %c0_i32_1 = arith.constant 0 : i32
    %c0_i32_2 = arith.constant 0 : i32
    return %c0_i32, %c0_i32_0, %c0_i32_1 : i32, i32, i32
  }
  func.func @transform_17(%arg0: i32) -> (i32, i32, i32) {
    %c0_i32 = arith.constant 0 : i32
    %c0_i32_0 = arith.constant 0 : i32
    %c0_i32_1 = arith.constant 0 : i32
    %c0_i32_2 = arith.constant 0 : i32
    return %c0_i32, %c0_i32_0, %c0_i32_1 : i32, i32, i32
  }
  func.func @transform_18(%arg0: i32) -> (i32, i32, i32) {
    %c0_i32 = arith.constant 0 : i32
    %c0_i32_0 = arith.constant 0 : i32
    %c0_i32_1 = arith.constant 0 : i32
    %c0_i32_2 = arith.constant 0 : i32
    return %c0_i32, %c0_i32_0, %c0_i32_1 : i32, i32, i32
  }
  func.func @transform_19(%arg0: i32) -> (i32, i32, i32) {
    %c0_i32 = arith.constant 0 : i32
    %c0_i32_0 = arith.constant 0 : i32
    %c0_i32_1 = arith.constant 0 : i32
    %c0_i32_2 = arith.constant 0 : i32
    return %c0_i32, %c0_i32_0, %c0_i32_1 : i32, i32, i32
  }
  func.func @transform_20(%arg0: i32) -> (i32, i32) {
    %c0_i32 = arith.constant 0 : i32
    %c0_i32_0 = arith.constant 0 : i32
    %c0_i32_1 = arith.constant 0 : i32
    return %c0_i32, %c0_i32_0 : i32, i32
  }
}

</mosaic_0001>

<bundles_post_ra>
// kernel: roberta_cls_forward.1
= control target key start
LH: loop header
LB: loop body
LE: loop exit
PB: predicated region body
PF: predicated region fallthrough
CT: control target
= control target key end

     0   :  { %s4051_s0 = inlined_call_operand.vmem [shape: f32[16,32], index: 0, kind: input, shape index: {}]   ;;  %s4052_s1 = inlined_call_operand.vmem [shape: f32[2,1,8], index: 1, kind: input, shape index: {}]   ;;  %s4053_s2 = inlined_call_operand.vmem [shape: f32[1,32], index: 2, kind: input, shape index: {}]   ;;  %s4054_s3 = inlined_call_operand.vmem [shape: f32[1,32], index: 3, kind: input, shape index: {}]   ;;  %s4055_s4 = inlined_call_operand.vmem [shape: f32[2,32,32], index: 4, kind: input, shape index: {}]   ;;  %s4056_s5 = inlined_call_operand.vmem [shape: f32[2,1,32], index: 5, kind: input, shape index: {}]   ;;  %s4057_s6 = inlined_call_operand.vmem [shape: f32[2,32,32], index: 6, kind: input, shape index: {}]   ;;  %s4058_s7 = inlined_call_operand.vmem [shape: f32[2,1,32], index: 7, kind: input, shape index: {}]   ;;  %s4059_s8 = inlined_call_operand.vmem [shape: f32[2,32,32], index: 8, kind: input, shape index: {}]   ;;  %s4060_s9 = inlined_call_operand.vmem [shape: f32[2,1,32], index: 9, kind: input, shape index: {}]   ;;  %s4061_s10 = inlined_call_operand.vmem [shape: f32[2,32,32], index: 10, kind: input, shape index: {}]   ;;  %s4062_s11 = inlined_call_operand.vmem [shape: f32[2,1,32], index: 11, kind: input, shape index: {}]   ;;  %s4063_s12 = inlined_call_operand.vmem [shape: f32[2,1,32], index: 12, kind: input, shape index: {}]   ;;  %s4064_s13 = inlined_call_operand.vmem [shape: f32[2,1,32], index: 13, kind: input, shape index: {}]   ;;  %s4065_s14 = inlined_call_operand.vmem [shape: f32[2,32,64], index: 14, kind: input, shape index: {}]   ;;  %s4066_s15 = inlined_call_operand.vmem [shape: f32[2,1,64], index: 15, kind: input, shape index: {}]   ;;  %s4067_s16 = inlined_call_operand.vmem [shape: f32[2,64,32], index: 16, kind: input, shape index: {}]   ;;  %s4068_s17 = inlined_call_operand.vmem [shape: f32[2,1,32], index: 17, kind: input, shape index: {}]   ;;  %s4069_s18 = inlined_call_operand.vmem [shape: f32[2,1,32], index: 18, kind: input, shape index: {}]   ;;  %s4070_s19 = inlined_call_operand.vmem [shape: f32[2,1,32], index: 19, kind: input, shape index: {}]   ;;  %s4071_s20 = inlined_call_operand.hbm [shape: f32[2,32], index: 20, kind: output, shape index: {}]  }
   0x1   :  { %4075 = sst [smem:[#allocation5_spill]] %s4051_s0 }
   0x2   :  { %4076 = sst [smem:[#allocation6_spill]] %s4052_s1 }
   0x3   :  { %4077 = sst [smem:[#allocation7_spill]] %s4053_s2 }
   0x4   :  { %4078 = sst [smem:[#allocation8_spill]] %s4054_s3 }
   0x5   :  { %4079 = sst [smem:[#allocation9_spill]] %s4055_s4 }
   0x6   :  { %s4080_s23 = sld [smem:[#allocation5_spill]]  ;;  %vm72_vm0 = vcmask 261120  }
   0xc   :  { %v66_v0 = vld [vmem:[%s4080_s23] sm:$0xff]  ;;  %v67_v1 = vld [vmem:[%s4080_s23 + $0x8] sm:$0xff] }
   0xd   :  { %25 = vsyncpa [#allocation3], 0  ;;  %v73_v2 = vsel %vm72_vm0, %v66_v0, 0.0  ;;  %v76_v3 = vsel %vm72_vm0, %v67_v1, 0.0  ;;  %s4081_s26 = sld [smem:[#allocation9_spill]]  ;;  %v126_v16 = vld [vmem:[%s4059_s8] sm:$0xff] }
   0xe   :  { %74 = vadd.xlane.f32.xlu0 %v73_v2  ;;  %v127_v18 = vld [vmem:[%s4059_s8 + $0x8] sm:$0xff]  ;;  %v128_v23 = vld [vmem:[%s4059_s8 + $0x10] sm:$0xff]  ;;  %v129_v24 = vld [vmem:[%s4059_s8 + $0x18] sm:$0xff]  ;;  %s4082_s21 = sld [smem:[#allocation7_spill]]  ;;  %s4083_s23 = sld [smem:[#allocation8_spill]]  ;;  %v3467_v48 = vmov 0.0  }
   0xf   :  { %v3282_v21 = vpack.c.bf16 %v127_v18, %v126_v16  ;;  %v3286_v25 = vpack.c.bf16 %v129_v24, %v128_v23  ;;  %v121_v26 = vld [vmem:[%s4057_s6] sm:$0xff]  ;;  %v122_v27 = vld [vmem:[%s4057_s6 + $0x8] sm:$0xff]  ;;  %v123_v43 = vld [vmem:[%s4057_s6 + $0x10] sm:$0xff]  ;;  %vm3468_vm1 = vmmov 0   ;;  %vm403_vm2 = vcmask 130048   ;;  %s4084_s22 = sld [smem:[#allocation6_spill]] }
  0x10   :  { %v3274_v28 = vpack.c.bf16 %v122_v27, %v121_v26  ;;  %v124_v44 = vld [vmem:[%s4057_s6 + $0x18] sm:$0xff]  ;;  %v2824_v49 = vld [vmem:[%s4060_s9] ss:$0 sm:$0xff]  ;;  %vm572_vm3 = vcmask 64512   ;;  %s3469_s2 = smov 112   ;;  %vm1329_vm4 = vcmask 523264  }
  0x11   :  { %3283 = vmatprep.subr.bf16.mxu0 %v3282_v21  ;;  %v3278_v47 = vpack.c.bf16 %v124_v44, %v123_v43  ;;  %v2821_v55 = vld [vmem:[%s4058_s7] ss:$0 sm:$0xff]  ;;  %vm2798_vm5 = vcmask 1040384   ;;  %vm2800_vm6 = vcmask 254976  }
  0x12   :  { %77 = vadd.xlane.f32.xlu0 %v76_v3  ;;  %3285 = vmatpush3.bf16.msra.mxu0 %v3282_v21  ;;  %v2818_v58 = vld [vmem:[%s4056_s5] ss:$0 sm:$0xff] }
  0x13   :  { %v116_v14 = vld [vmem:[%s4081_s26] sm:$0xff]  ;;  %v117_v15 = vld [vmem:[%s4081_s26 + $0x8] sm:$0xff]  ;;  %v118_v19 = vld [vmem:[%s4081_s26 + $0x10] sm:$0xff]  ;;  %3287 = vmatprep.subr.bf16.mxu0 %v3286_v25 }
  0x14   :  { %v3266_v17 = vpack.c.bf16 %v117_v15, %v116_v14  ;;  %v119_v20 = vld [vmem:[%s4081_s26 + $0x18] sm:$0xff]  ;;  %v2816_v36 = vld [vmem:[%s4082_s21] ss:$0 sm:$0xff]  ;;  %s3470_s21 = smov 16  }
  0x15   :  { %v3270_v22 = vpack.c.bf16 %v119_v20, %v118_v19  ;;  %v2817_v38 = vld [vmem:[%s4083_s23] ss:$0 sm:$0xff] }
  0x16   :  { %3267 = vmatprep.subr.bf16.mxu1 %v3266_v17  ;;  %3289 = vmatpush3.bf16.msra.mxu0 %v3286_v25 }
  0x17   :  { %3269 = vmatpush3.bf16.msra.mxu1 %v3266_v17  ;;  %3081 = vmatprep.subr.mxu0 %v3467_v48 }
  0x18   :  { %3271 = vmatprep.subr.bf16.mxu1 %v3270_v22 }
  0x1b   :  { %3273 = vmatpush3.bf16.msra.mxu1 %v3270_v22 }
  0x1c   :  { %3275 = vmatprep.subr.bf16.mxu1 %v3274_v28 }
  0x9b   :  { %v75_v4 = vpop.xlane.xlu0 %74 }
  0x9c   :  { %v80_v5 = vmul.f32 0.03125, %v75_v4 }
  0x9e   :  { %v82_v6 = vsub.f32 %v66_v0, %v80_v5 }
  0x9f   :  { %v78_v7 = vpop.xlane.xlu0 %77 }
  0xa0   :  { %v81_v8 = vmul.f32 0.03125, %v78_v7  ;;  %v84_v9 = vmul.f32 %v82_v6, %v82_v6 }
  0xa2   :  { %v83_v10 = vsub.f32 %v67_v1, %v81_v8  ;;  %v86_v11 = vsel %vm72_vm0, %v84_v9, 0.0  ;;  %v3681_v1 = vld [vmem:[%s4084_s22] ss:$0 sm:$0xff] }
  0xa3   :  { %87 = vadd.xlane.f32.xlu1 %v86_v11 }
  0xa4   :  { %v85_v12 = vmul.f32 %v83_v10, %v83_v10 }
  0xa6   :  { %v89_v13 = vsel %vm72_vm0, %v85_v12, 0.0 }
  0xa7   :  { %90 = vadd.xlane.f32.xlu1 %v89_v13 }
 0x130   :  { %v88_v29 = vpop.xlane.xlu1 %87 }
 0x131   :  { %v92_v30 = vmul.f32 0.03125, %v88_v29 }
 0x133   :  { %v94_v31 = vadd.f32 1e-05, %v92_v30 }
 0x134   :  { %v91_v32 = vpop.xlane.xlu1 %90 }
 0x135   :  { %3383 = vrsqrt.f32 %v94_v31  ;;  %v93_v33 = vmul.f32 0.03125, %v91_v32 }
 0x137   :  { %v95_v34 = vadd.f32 1e-05, %v93_v33 }
 0x139   :  { %3385 = vrsqrt.f32 %v95_v34 }
 0x13f   :  { %v3384_v35 = vpop.eup %3383 }
 0x140   :  { %v98_v37 = vmul.f32 %v3384_v35, %v82_v6  ;;  %v3687_v6 = vld [vmem:[%s4084_s22 + $0x1] ss:$0 sm:$0xff]  ;;  %s3471_s22 = smov [#allocation2]  }
 0x141   :  { %s2808_s23 = sshll.u32 %s3471_s22, 4  ;;  %s2809_s23 = int_to_ptr.vmem [resolvable:$true] %s2808_s23 }
 0x142   :  { %v106_v39 = vmul.f32 %v2816_v36, %v98_v37  ;;  %p3448_p1 = scmp.lt.s32.totalorder %s2809_s23, %s2809_s23 }
 0x143   :  { %v3386_v40 = vpop.eup %3385 }
 0x144   :  { %v3623_v41 = vadd.f32 %v2817_v38, %v106_v39  ;;  %v99_v42 = vmul.f32 %v3386_v40, %v83_v10 }
 0x146   :  { %3046 = vmatprep.mubr.msk.f32.mxu1 %vm72_vm0, %v3623_v41  ;;  %3068 = vmatprep.mubr.msk.f32.mxu0 %vm72_vm0, %v3623_v41  ;;  %v107_v45 = vmul.f32 %v2816_v36, %v99_v42 }
 0x148   :  { %v3635_v46 = vadd.f32 %v2817_v38, %v107_v45 }
 0x14a   :  { %3047 = vmatmul.mubr.msk.f32.vlgmr.msra.gmra.mrb[0].mxu1 %vm72_vm0, %v3635_v46  ;;  %3069 = vmatmul.mubr.msk.f32.vlgmr.msra.gmra.mrb[0].mxu0 %vm72_vm0, %v3635_v46 }
 0x14b   :  { %3277 = vmatpush3.bf16.msra.mxu1 %v3274_v28  ;;  %3057 = vmatprep.mubr.msk.f32.mxu1 %vm72_vm0, %v3623_v41 }
 0x14c   :  { %3279 = vmatprep.subr.bf16.mxu1 %v3278_v47  ;;  %3083 = vmatprep.mubr.msk.f32.mxu0 %vm3468_vm1, %v3467_v48 }
 0x14f   :  { %3281 = vmatpush3.bf16.msra.mxu1 %v3278_v47 }
 0x150   :  { %3071 = vmatprep.subr.mxu1 %v3467_v48 }
 0x152   :  { %3058 = vmatmul.mubr.msk.f32.vlgmr.msra.gmra.mrb[2].mxu1 %vm72_vm0, %v3635_v46 }
 0x153   :  { %3073 = vmatprep.mubr.msk.f32.mxu1 %vm3468_vm1, %v3467_v48 }
 0x21d   :  { %v3048_v50 = vpop.f32.mrb[0].mxu1  ;;  %v3070_v51 = vpop.f32.mrb[0].mxu0 }
 0x21e   :  { %v232_v52 = vpop.f32.mrb[1].mxu1  ;;  %v394_v53 = vpop.f32.mrb[1].mxu0  ;;  %v238_v62 = vadd.f32 %v3048_v50, %v2818_v58  ;;  %v3671_v63 = vadd.f32 %v3070_v51, %v2824_v49 }
 0x21f   :  { %v3654_v54 = vadd.f32 %v2824_v49, %v394_v53  ;;  %v233_v60 = vadd.f32 %v2818_v58, %v232_v52 }
 0x221   :  { %3082 = vmatpush3.msra.mxu0 %v3654_v54 }
 0x222   :  { %3091 = vmatprep.subr.mxu0 %v3467_v48 }
 0x225   :  { %v3059_v56 = vpop.f32.mrb[2].mxu1 }
 0x226   :  { %v313_v57 = vpop.f32.mrb[3].mxu1  ;;  %v319_v61 = vadd.f32 %v3059_v56, %v2821_v55 }
 0x227   :  { %v314_v59 = vadd.f32 %v2821_v55, %v313_v57 }
 0x229   :  { %3072 = vmatpush3.xpose.msk.msra.mxu1 %vm403_vm2, %v314_v59 }
 0x22a   :  { %3076 = vmatprep.subr.mxu1 %v3467_v48 }
 0x22c   :  { %3074 = vmatmul.mubr.msk.f32.vlgmr.msra.gmra.mrb[4].mxu1 %vm403_vm2, %v233_v60 }
 0x22d   :  { %3077 = vmatpush3.xpose.msk.msra.mxu1 %vm403_vm2, %v319_v61  ;;  %3078 = vmatprep.mubr.msk.f32.mxu1 %vm3468_vm1, %v3467_v48 }
 0x22e   :  { %3086 = vmatprep.subr.mxu1 %v3467_v48 }
 0x230   :  { %3079 = vmatmul.mubr.msk.f32.vlgmr.msra.gmra.mrb[6].mxu1 %vm403_vm2, %v238_v62 }
 0x231   :  { %3087 = vmatpush3.msra.mxu1 %v3671_v63  ;;  %3088 = vmatprep.mubr.msk.f32.mxu1 %vm3468_vm1, %v3467_v48 }
 0x232   :  { %3096 = vmatprep.subr.mxu1 %v3467_v48 }
 0x2ff   :  { %v476_v0 = vpop.f32.mrb[4].mxu1 }
 0x300   :  { %v556_v2 = vmul.f32 0.25, %v476_v0  ;;  %v3075_v3 = vpop.f32.mrb[5].mxu1 }
 0x302   :  { %v570_v4 = vadd.f32 %v3681_v1, %v556_v2 }
 0x303   :  { %v552_v5 = vpop.f32.mrb[6].mxu1 }
 0x304   :  { %v557_v7 = vmul.f32 0.25, %v552_v5  ;;  %v3080_v8 = vpop.f32.mrb[7].mxu1  ;;  %v573_v9 = vsel %vm572_vm3, %v570_v4, -inf  ;;  %v131_v5 = vld [vmem:[%s4061_s10] sm:$0xff] }
 0x305   :  { %574 = vmax.xlane.f32.xlu0 %v573_v9  ;;  %v133_v8 = vld [vmem:[%s4061_s10 + $0x10] sm:$0xff]  ;;  %v134_v9 = vld [vmem:[%s4061_s10 + $0x18] sm:$0xff] }
 0x306   :  { %v571_v10 = vadd.f32 %v3687_v6, %v557_v7 }
 0x308   :  { %v576_v11 = vsel %vm572_vm3, %v571_v10, -inf }
 0x309   :  { %577 = vmax.xlane.f32.xlu1 %v576_v11 }
 0x31a   :  { %821 = vrot.lane.b32.xlu1 %v319_v61, %s3469_s2 }
 0x31e   :  { %741 = vrot.lane.b32.xlu1 %v233_v60, %s3469_s2 }
 0x392   :  { %v575_v12 = vpop.xlane.xlu0 %574 }
 0x393   :  { %v579_v13 = vsub.f32 %v570_v4, %v575_v12 }
 0x395   :  { %v581_v14 = vmul.f32 1.442695, %v579_v13 }
 0x396   :  { %v578_v15 = vpop.xlane.xlu1 %577 }
 0x397   :  { %3387 = vpow2.f32 %v581_v14  ;;  %v580_v16 = vsub.f32 %v571_v10, %v578_v15  ;;  %v3294_v10 = vpack.c.bf16 %v134_v9, %v133_v8  ;;  %v149_v8 = vld [vmem:[%s4067_s16 + $0x30] sm:$0xff]  ;;  %v150_v9 = vld [vmem:[%s4067_s16 + $0x38] sm:$0xff] }
 0x399   :  { %v583_v17 = vmul.f32 1.442695, %v580_v16 }
 0x39a   :  { %v822_v22 = vpop.permute.xlu1 %821 }
 0x39b   :  { %3389 = vpow2.f32 %v583_v17 }
 0x39e   :  { %v742_v23 = vpop.permute.xlu1 %741 }
 0x3a1   :  { %v3388_v18 = vpop.eup %3387 }
 0x3a2   :  { %v585_v19 = vsel %vm572_vm3, %v3388_v18, 0.0 }
 0x3a3   :  { %586 = vadd.xlane.f32.xlu0 %v585_v19  ;;  %v2841_v19 = vld [vmem:[%s4062_s11] ss:$0 sm:$0xff] }
 0x3a5   :  { %v3390_v20 = vpop.eup %3389 }
 0x3a6   :  { %v588_v21 = vsel %vm572_vm3, %v3390_v20, 0.0 }
 0x3a7   :  { %589 = vadd.xlane.f32.xlu1 %v588_v21 }
 0x3b8   :  { %819 = vrot.lane.b32.xlu1 %v238_v62, %s3469_s2 }
 0x3b9   :  { %743 = vrot.lane.b32.xlu0 %v314_v59, %s3469_s2 }
 0x430   :  { %v587_v24 = vpop.xlane.xlu0 %586 }
 0x431   :  { %3391 = vrcp.f32 %v587_v24 }
 0x434   :  { %v590_v25 = vpop.xlane.xlu1 %589  ;;  %v744_v28 = vpop.permute.xlu0 %743 }
 0x435   :  { %3393 = vrcp.f32 %v590_v25 }
 0x438   :  { %v820_v31 = vpop.permute.xlu1 %819 }
 0x43b   :  { %v3392_v26 = vpop.eup %3391 }
 0x43c   :  { %v593_v27 = vmul.f32 %v3392_v26, %v3388_v18 }
 0x43e   :  { %3084 = vmatmul.mubr.msk.f32.vlgmr.msra.gmra.mrb[2].mxu0 %vm572_vm3, %v593_v27 }
 0x43f   :  { %v3394_v29 = vpop.eup %3393  ;;  %3092 = vmatpush3.xpose.msk.msra.mxu0 %vm403_vm2, %v744_v28  ;;  %3093 = vmatprep.mubr.msk.f32.mxu0 %vm3468_vm1, %v3467_v48 }
 0x440   :  { %v594_v30 = vmul.f32 %v3394_v29, %v3390_v20  ;;  %3101 = vmatprep.subr.mxu0 %v3467_v48 }
 0x442   :  { %3089 = vmatmul.mubr.msk.f32.vlgmr.msra.gmra.mrb[8].mxu1 %vm572_vm3, %v594_v30  ;;  %3094 = vmatmul.mubr.msk.f32.vlgmr.msra.gmra.mrb[4].mxu0 %vm403_vm2, %v742_v23 }
 0x443   :  { %3097 = vmatpush3.xpose.msk.msra.mxu1 %vm403_vm2, %v822_v22  ;;  %3098 = vmatprep.mubr.msk.f32.mxu1 %vm3468_vm1, %v3467_v48 }
 0x444   :  { %3106 = vmatprep.subr.mxu1 %v3467_v48  ;;  %3103 = vmatprep.mubr.msk.f32.mxu0 %vm3468_vm1, %v3467_v48 }
 0x446   :  { %3099 = vmatmul.mubr.msk.f32.vlgmr.msra.gmra.mrb[10].mxu1 %vm403_vm2, %v820_v31 }
 0x447   :  { %3108 = vmatprep.mubr.msk.f32.mxu1 %vm3468_vm1, %v3467_v48 }
 0x511   :  { %v3714_v32 = vpop.f32.mrb[2].mxu0 }
 0x512   :  { %v3085_v33 = vpop.f32.mrb[3].mxu0 }
 0x515   :  { %v3716_v34 = vpop.f32.mrb[8].mxu1  ;;  %v815_v35 = vpop.f32.mrb[4].mxu0 }
 0x516   :  { %v897_v36 = vmul.f32 0.25, %v815_v35  ;;  %v3090_v37 = vpop.f32.mrb[9].mxu1  ;;  %v3095_v38 = vpop.f32.mrb[5].mxu0 }
 0x517   :  { %v139_v37 = vld [vmem:[%s4065_s14 + $0x8] sm:$0xff] }
 0x518   :  { %v899_v39 = vadd.f32 %v3681_v1, %v897_v36 }
 0x519   :  { %v893_v40 = vpop.f32.mrb[10].mxu1 }
 0x51a   :  { %v898_v42 = vmul.f32 0.25, %v893_v40  ;;  %v3100_v43 = vpop.f32.mrb[11].mxu1  ;;  %v901_v44 = vsel %vm572_vm3, %v899_v39, -inf  ;;  %v141_v40 = vld [vmem:[%s4065_s14 + $0x18] sm:$0xff] }
 0x51b   :  { %902 = vmax.xlane.f32.xlu0 %v901_v44 }
 0x51c   :  { %v900_v45 = vadd.f32 %v3687_v6, %v898_v42 }
 0x51e   :  { %v904_v47 = vsel %vm572_vm3, %v900_v45, -inf }
 0x51f   :  { %905 = vmax.xlane.f32.xlu1 %v904_v47 }
 0x530   :  { %1001 = vrot.lane.b32.xlu1 %v3671_v63, %s3469_s2 }
 0x5a8   :  { %v903_v49 = vpop.xlane.xlu0 %902 }
 0x5a9   :  { %v907_v50 = vsub.f32 %v899_v39, %v903_v49  ;;  %v140_v39 = vld [vmem:[%s4065_s14 + $0x10] sm:$0xff] }
 0x5aa   :  { %v3302_v42 = vpack.c.bf16 %v141_v40, %v140_v39 }
 0x5ab   :  { %v909_v51 = vmul.f32 1.442695, %v907_v50 }
 0x5ac   :  { %v906_v52 = vpop.xlane.xlu1 %905 }
 0x5ad   :  { %3395 = vpow2.f32 %v909_v51  ;;  %v908_v53 = vsub.f32 %v900_v45, %v906_v52  ;;  %v2844_v52 = vld [vmem:[%s4063_s12] ss:$0 sm:$0xff] }
 0x5af   :  { %v911_v55 = vmul.f32 1.442695, %v908_v53 }
 0x5b0   :  { %v1002_v56 = vpop.permute.xlu1 %1001 }
 0x5b1   :  { %3397 = vpow2.f32 %v911_v55  ;;  %3107 = vmatpush3.msra.mxu1 %v1002_v56  ;;  %v2845_v55 = vld [vmem:[%s4064_s13] ss:$0 sm:$0xff] }
 0x5b7   :  { %v3396_v57 = vpop.eup %3395 }
 0x5b8   :  { %v913_v58 = vsel %vm572_vm3, %v3396_v57, 0.0 }
 0x5b9   :  { %914 = vadd.xlane.f32.xlu0 %v913_v58 }
 0x5bb   :  { %v3398_v59 = vpop.eup %3397 }
 0x5bc   :  { %v916_v60 = vsel %vm572_vm3, %v3398_v59, 0.0 }
 0x5bd   :  { %917 = vadd.xlane.f32.xlu0 %v916_v60 }
 0x5d3   :  { %924 = vrot.lane.b32.xlu0 %v3654_v54, %s3469_s2  ;;  %v132_v54 = vld [vmem:[%s4061_s10 + $0x8] sm:$0xff] }
 0x5d4   :  { %v3290_v7 = vpack.c.bf16 %v132_v54, %v131_v5  ;;  %v147_v5 = vld [vmem:[%s4067_s16 + $0x20] sm:$0xff]  ;;  %v148_v54 = vld [vmem:[%s4067_s16 + $0x28] sm:$0xff] }
 0x646   :  { %v915_v61 = vpop.xlane.xlu0 %914 }
 0x647   :  { %3399 = vrcp.f32 %v915_v61 }
 0x64a   :  { %v918_v62 = vpop.xlane.xlu0 %917 }
 0x64b   :  { %3401 = vrcp.f32 %v918_v62  ;;  %v143_v62 = vld [vmem:[%s4067_s16] sm:$0xff] }
 0x64e   :  { %v925_v63 = vpop.permute.xlu0 %924 }
 0x64f   :  { %3102 = vmatpush3.msra.mxu0 %v925_v63  ;;  %v144_v63 = vld [vmem:[%s4067_s16 + $0x8] sm:$0xff] }
 0x650   :  { %3291 = vmatprep.subr.bf16.mxu0 %v3290_v7 }
 0x651   :  { %v3400_v0 = vpop.eup %3399 }
 0x652   :  { %v921_v2 = vmul.f32 %v3400_v0, %v3396_v57  ;;  %v3306_v0 = vpack.c.bf16 %v144_v63, %v143_v62  ;;  %v2857_v62 = vld [vmem:[%s4081_s26 + $0x38] sm:$0xff]  ;;  %v2866_v63 = vld [vmem:[%s4059_s8 + $0x30] sm:$0xff] }
 0x654   :  { %3104 = vmatmul.mubr.msk.f32.vlgmr.msra.gmra.mrb[6].mxu0 %vm572_vm3, %v921_v2  ;;  %v145_v2 = vld [vmem:[%s4067_s16 + $0x10] sm:$0xff] }
 0x655   :  { %v3402_v3 = vpop.eup %3401  ;;  %3293 = vmatpush3.bf16.msra.mxu0 %v3290_v7  ;;  %v3314_v7 = vpack.c.bf16 %v148_v54, %v147_v5  ;;  %v2860_v5 = vld [vmem:[%s4057_s6 + $0x28] sm:$0xff] }
 0x656   :  { %v922_v4 = vmul.f32 %v3402_v3, %v3398_v59  ;;  %3295 = vmatprep.subr.bf16.mxu0 %v3294_v10  ;;  %v146_v3 = vld [vmem:[%s4067_s16 + $0x18] sm:$0xff] }
 0x658   :  { %3109 = vmatmul.mubr.msk.f32.vlgmr.msra.gmra.mrb[12].mxu1 %vm572_vm3, %v922_v4  ;;  %v3310_v4 = vpack.c.bf16 %v146_v3, %v145_v2  ;;  %v2867_v2 = vld [vmem:[%s4059_s8 + $0x38] sm:$0xff] }
 0x659   :  { %3297 = vmatpush3.bf16.msra.mxu0 %v3294_v10  ;;  %v3318_v10 = vpack.c.bf16 %v150_v9, %v149_v8  ;;  %v3342_v3 = vpack.c.bf16 %v2867_v2, %v2866_v63 }
 0x65a   :  { %3307 = vmatprep.subr.bf16.mxu0 %v3306_v0 }
 0x727   :  { %v996_v11 = vpop.f32.mrb[6].mxu0 }
 0x728   :  { %1079 = vrot.lane.b32.xlu1 %v996_v11, %s3470_s21  ;;  %v3105_v12 = vpop.f32.mrb[7].mxu0  ;;  %v2846_v11 = vld [vmem:[%s4066_s15] ss:$0 sm:$0xff] }
 0x72b   :  { %v1073_v13 = vpop.f32.mrb[12].mxu1 }
 0x72c   :  { %1081 = vrot.lane.b32.xlu1 %v1073_v13, %s3470_s21  ;;  %v3110_v14 = vpop.f32.mrb[13].mxu1 }
 0x79a   :  { %v1080_v15 = vpop.permute.xlu1 %1079 }
 0x79b   :  { %v1085_v16 = vsel %vm403_vm2, %v3714_v32, %v1080_v15 }
 0x79c   :  { %3119 = vmatprep.mubr.msk.f32.mxu0 %vm72_vm0, %v1085_v16 }
 0x79e   :  { %v1082_v17 = vpop.permute.xlu1 %1081 }
 0x79f   :  { %v1086_v18 = vsel %vm403_vm2, %v3716_v34, %v1082_v17 }
 0x7a0   :  { %3120 = vmatmul.mubr.msk.f32.vlgmr.msra.gmra.mrb[8].mxu0 %vm72_vm0, %v1086_v18 }
 0x7a1   :  { %3309 = vmatpush3.bf16.msra.mxu0 %v3306_v0 }
 0x7a2   :  { %3311 = vmatprep.subr.bf16.mxu0 %v3310_v4 }
 0x7a5   :  { %3313 = vmatpush3.bf16.msra.mxu0 %v3310_v4  ;;  %v2859_v4 = vld [vmem:[%s4057_s6 + $0x20] sm:$0xff] }
 0x7a6   :  { %3315 = vmatprep.subr.bf16.mxu0 %v3314_v7  ;;  %v3330_v54 = vpack.c.bf16 %v2860_v5, %v2859_v4 }
 0x7a9   :  { %3317 = vmatpush3.bf16.msra.mxu0 %v3314_v7 }
 0x7aa   :  { %3319 = vmatprep.subr.bf16.mxu0 %v3318_v10 }
 0x7ad   :  { %3321 = vmatpush3.bf16.msra.mxu0 %v3318_v10 }
 0x873   :  { %v3121_v20 = vpop.f32.mrb[8].mxu0 }
 0x874   :  { %v1171_v21 = vadd.f32 %v3121_v20, %v2841_v19  ;;  %v1165_v22 = vpop.f32.mrb[9].mxu0 }
 0x875   :  { %v1166_v23 = vadd.f32 %v2841_v19, %v1165_v22 }
 0x876   :  { %v1175_v24 = vadd.f32 %v1171_v21, %v3635_v46 }
 0x877   :  { %v1174_v25 = vadd.f32 %v1166_v23, %v3623_v41  ;;  %v138_v41 = vld [vmem:[%s4065_s14] sm:$0xff] }
 0x878   :  { %v1179_v26 = vsel %vm72_vm0, %v1175_v24, 0.0  ;;  %v3298_v38 = vpack.c.bf16 %v139_v37, %v138_v41 }
 0x879   :  { %1180 = vadd.xlane.f32.xlu1 %v1179_v26  ;;  %v1176_v27 = vsel %vm72_vm0, %v1174_v25, 0.0 }
 0x87a   :  { %1177 = vadd.xlane.f32.xlu0 %v1176_v27  ;;  %3299 = vmatprep.subr.bf16.mxu1 %v3298_v38 }
 0x87b   :  { %3301 = vmatpush3.bf16.msra.mxu1 %v3298_v38 }
 0x87c   :  { %3303 = vmatprep.subr.bf16.mxu1 %v3302_v42 }
 0x87f   :  { %3305 = vmatpush3.bf16.msra.mxu1 %v3302_v42 }
 0x906   :  { %v1181_v28 = vpop.xlane.xlu1 %1180 }
 0x907   :  { %v1183_v29 = vmul.f32 0.03125, %v1181_v28  ;;  %v1178_v30 = vpop.xlane.xlu0 %1177 }
 0x908   :  { %v1182_v31 = vmul.f32 0.03125, %v1178_v30 }
 0x909   :  { %v1185_v32 = vsub.f32 %v1175_v24, %v1183_v29 }
 0x90a   :  { %v1184_v33 = vsub.f32 %v1174_v25, %v1182_v31 }
 0x90b   :  { %v1187_v36 = vmul.f32 %v1185_v32, %v1185_v32 }
 0x90c   :  { %v1186_v34 = vmul.f32 %v1184_v33, %v1184_v33 }
 0x90d   :  { %v1191_v46 = vsel %vm72_vm0, %v1187_v36, 0.0 }
 0x90e   :  { %v1188_v35 = vsel %vm72_vm0, %v1186_v34, 0.0  ;;  %v2849_v34 = vld [vmem:[%s4068_s17] ss:$0 sm:$0xff] }
 0x90f   :  { %1189 = vadd.xlane.f32.xlu0 %v1188_v35 }
 0x913   :  { %1192 = vadd.xlane.f32.xlu0 %v1191_v46 }
 0x99c   :  { %v1190_v43 = vpop.xlane.xlu0 %1189 }
 0x99d   :  { %v1194_v44 = vmul.f32 0.03125, %v1190_v43 }
 0x99f   :  { %v1196_v45 = vadd.f32 1e-05, %v1194_v44 }
 0x9a0   :  { %v1193_v47 = vpop.xlane.xlu0 %1192 }
 0x9a1   :  { %3403 = vrsqrt.f32 %v1196_v45  ;;  %v1195_v49 = vmul.f32 0.03125, %v1193_v47 }
 0x9a3   :  { %v1197_v50 = vadd.f32 1e-05, %v1195_v49 }
 0x9a5   :  { %3405 = vrsqrt.f32 %v1197_v50 }
 0x9ab   :  { %v3404_v51 = vpop.eup %3403 }
 0x9ac   :  { %v1200_v53 = vmul.f32 %v3404_v51, %v1184_v33 }
 0x9ae   :  { %v1208_v56 = vmul.f32 %v2844_v52, %v1200_v53 }
 0x9af   :  { %v3406_v57 = vpop.eup %3405 }
 0x9b0   :  { %v1201_v58 = vmul.f32 %v3406_v57, %v1185_v32  ;;  %v1216_v59 = vadd.f32 %v2845_v55, %v1208_v56  ;;  %v2855_v56 = vld [vmem:[%s4081_s26 + $0x28] sm:$0xff] }
 0x9b2   :  { %v1209_v60 = vmul.f32 %v2844_v52, %v1201_v58  ;;  %3130 = vmatprep.mubr.msk.f32.mxu1 %vm72_vm0, %v1216_v59  ;;  %v2864_v58 = vld [vmem:[%s4059_s8 + $0x20] sm:$0xff] }
 0x9b4   :  { %v1217_v61 = vadd.f32 %v2845_v55, %v1209_v60  ;;  %v2854_v55 = vld [vmem:[%s4081_s26 + $0x20] sm:$0xff] }
 0x9b5   :  { %v3322_v57 = vpack.c.bf16 %v2855_v56, %v2854_v55 }
 0x9b6   :  { %3131 = vmatmul.mubr.msk.f32.vlgmr.msra.gmra.mrb[14].mxu1 %vm72_vm0, %v1217_v61 }
 0x9b7   :  { %3323 = vmatprep.subr.bf16.mxu1 %v3322_v57 }
 0x9b8   :  { %3325 = vmatpush3.bf16.msra.mxu1 %v3322_v57 }
 0xa89   :  { %v3132_v12 = vpop.f32.mrb[14].mxu1 }
 0xa8a   :  { %v1302_v13 = vadd.f32 %v3132_v12, %v2846_v11  ;;  %v1296_v14 = vpop.f32.mrb[15].mxu1 }
 0xa8b   :  { %v1297_v15 = vadd.f32 %v2846_v11, %v1296_v14  ;;  %v2852_v14 = vld [vmem:[%s4069_s18] ss:$0 sm:$0xff] }
 0xa8c   :  { %v1308_v16 = vmul.f32 0.044715, %v1302_v13  ;;  %v1306_v31 = vmul.f32 0.5, %v1302_v13 }
 0xa8d   :  { %v1307_v17 = vmul.f32 0.044715, %v1297_v15  ;;  %v1305_v29 = vmul.f32 0.5, %v1297_v15 }
 0xa8e   :  { %v1310_v18 = vmul.f32 %v1308_v16, %v1302_v13 }
 0xa8f   :  { %v1309_v19 = vmul.f32 %v1307_v17, %v1297_v15 }
 0xa90   :  { %v1312_v20 = vmul.f32 %v1310_v18, %v1302_v13  ;;  %v2853_v18 = vld [vmem:[%s4070_s19] ss:$0 sm:$0xff] }
 0xa91   :  { %v1311_v21 = vmul.f32 %v1309_v19, %v1297_v15 }
 0xa92   :  { %v1314_v22 = vadd.f32 %v1312_v20, %v1302_v13 }
 0xa93   :  { %v1313_v23 = vadd.f32 %v1311_v21, %v1297_v15  ;;  %v2861_v21 = vld [vmem:[%s4057_s6 + $0x30] sm:$0xff] }
 0xa94   :  { %v1316_v24 = vmul.f32 0.7978846, %v1314_v22  ;;  %v2862_v22 = vld [vmem:[%s4057_s6 + $0x38] sm:$0xff] }
 0xa95   :  { %v1315_v25 = vmul.f32 0.7978846, %v1313_v23 }
 0xa96   :  { %3407 = vtanh.f32 %v1316_v24 }
 0xa97   :  { %3409 = vtanh.f32 %v1315_v25  ;;  %v3334_v25 = vpack.c.bf16 %v2862_v22, %v2861_v21 }
 0xaa0   :  { %v3408_v26 = vpop.eup %3407 }
 0xaa1   :  { %v3410_v27 = vpop.eup %3409  ;;  %v1320_v28 = vadd.f32 1.0, %v3408_v26  ;;  %v2898_v26 = vld [vmem:[%s4060_s9 + $0x1] ss:$0 sm:$0xff] }
 0xaa2   :  { %v1319_v30 = vadd.f32 1.0, %v3410_v27 }
 0xaa3   :  { %v1322_v33 = vmul.f32 %v1320_v28, %v1306_v31 }
 0xaa4   :  { %v1321_v32 = vmul.f32 %v1319_v30, %v1305_v29 }
 0xaa6   :  { %3149 = vmatprep.mubr.msk.f32.mxu0 %vm1329_vm4, %v1321_v32  ;;  %v2895_v32 = vld [vmem:[%s4058_s7 + $0x1] ss:$0 sm:$0xff] }
 0xaa7   :  { %3150 = vmatmul.mubr.msk.f32.vlgmr.msra.gmra.mrb[10].mxu0 %vm1329_vm4, %v1322_v33 }
 0xb7a   :  { %v3151_v35 = vpop.f32.mrb[10].mxu0 }
 0xb7b   :  { %v1408_v36 = vadd.f32 %v3151_v35, %v2849_v34  ;;  %v1402_v46 = vpop.f32.mrb[11].mxu0  ;;  %v2892_v35 = vld [vmem:[%s4056_s5 + $0x1] ss:$0 sm:$0xff] }
 0xb7c   :  { %v1403_v41 = vadd.f32 %v2849_v34, %v1402_v46 }
 0xb7d   :  { %v1412_v37 = vadd.f32 %v1408_v36, %v1217_v61  ;;  %v2856_v61 = vld [vmem:[%s4081_s26 + $0x30] sm:$0xff] }
 0xb7e   :  { %v1411_v38 = vadd.f32 %v1403_v41, %v1216_v59  ;;  %v2865_v59 = vld [vmem:[%s4059_s8 + $0x28] sm:$0xff]  ;;  %v3326_v0 = vpack.c.bf16 %v2857_v62, %v2856_v61 }
 0xb7f   :  { %v1416_v39 = vsel %vm72_vm0, %v1412_v37, 0.0  ;;  %v3338_v60 = vpack.c.bf16 %v2865_v59, %v2864_v58 }
 0xb80   :  { %1417 = vadd.xlane.f32.xlu1 %v1416_v39  ;;  %v1413_v40 = vsel %vm72_vm0, %v1411_v38, 0.0  ;;  %3327 = vmatprep.subr.bf16.mxu1 %v3326_v0 }
 0xb81   :  { %1414 = vadd.xlane.f32.xlu0 %v1413_v40  ;;  %3339 = vmatprep.subr.bf16.mxu0 %v3338_v60 }
 0xb82   :  { %3341 = vmatpush3.bf16.msra.mxu0 %v3338_v60  ;;  %3329 = vmatpush3.bf16.msra.mxu1 %v3326_v0 }
 0xb83   :  { %3343 = vmatprep.subr.bf16.mxu0 %v3342_v3  ;;  %3331 = vmatprep.subr.bf16.mxu1 %v3330_v54 }
 0xb86   :  { %3345 = vmatpush3.bf16.msra.mxu0 %v3342_v3 }
 0xb87   :  { %3195 = vmatprep.subr.mxu0 %v3467_v48 }
 0xc0d   :  { %v1418_v42 = vpop.xlane.xlu1 %1417 }
 0xc0e   :  { %v1420_v43 = vmul.f32 0.03125, %v1418_v42  ;;  %v1415_v44 = vpop.xlane.xlu0 %1414 }
 0xc0f   :  { %v1419_v45 = vmul.f32 0.03125, %v1415_v44 }
 0xc10   :  { %v1422_v47 = vsub.f32 %v1412_v37, %v1420_v43 }
 0xc11   :  { %v1421_v49 = vsub.f32 %v1411_v38, %v1419_v45 }
 0xc12   :  { %v1424_v50 = vmul.f32 %v1422_v47, %v1422_v47 }
 0xc13   :  { %v1423_v51 = vmul.f32 %v1421_v49, %v1421_v49 }
 0xc14   :  { %v1428_v52 = vsel %vm72_vm0, %v1424_v50, 0.0 }
 0xc15   :  { %1429 = vadd.xlane.f32.xlu1 %v1428_v52  ;;  %v1425_v53 = vsel %vm72_vm0, %v1423_v51, 0.0 }
 0xc16   :  { %1426 = vadd.xlane.f32.xlu0 %v1425_v53 }
 0xca2   :  { %v1430_v7 = vpop.xlane.xlu1 %1429 }
 0xca3   :  { %v1432_v8 = vmul.f32 0.03125, %v1430_v7  ;;  %v1427_v9 = vpop.xlane.xlu0 %1426 }
 0xca4   :  { %v1431_v10 = vmul.f32 0.03125, %v1427_v9 }
 0xca5   :  { %v1434_v11 = vadd.f32 1e-05, %v1432_v8 }
 0xca6   :  { %v1433_v12 = vadd.f32 1e-05, %v1431_v10 }
 0xca7   :  { %3411 = vrsqrt.f32 %v1434_v11 }
 0xca8   :  { %3413 = vrsqrt.f32 %v1433_v12 }
 0xcb1   :  { %v3412_v13 = vpop.eup %3411 }
 0xcb2   :  { %v3414_v15 = vpop.eup %3413  ;;  %v1438_v16 = vmul.f32 %v3412_v13, %v1422_v47 }
 0xcb3   :  { %v1437_v17 = vmul.f32 %v3414_v15, %v1421_v49 }
 0xcb4   :  { %v1446_v19 = vmul.f32 %v2852_v14, %v1438_v16 }
 0xcb5   :  { %v1445_v20 = vmul.f32 %v2852_v14, %v1437_v17 }
 0xcb6   :  { %v3860_v24 = vadd.f32 %v2853_v18, %v1446_v19 }
 0xcb7   :  { %v3858_v23 = vadd.f32 %v2853_v18, %v1445_v20 }
 0xcb9   :  { %3160 = vmatprep.mubr.msk.f32.mxu1 %vm72_vm0, %v3858_v23  ;;  %3182 = vmatprep.mubr.msk.f32.mxu0 %vm72_vm0, %v3858_v23 }
 0xcba   :  { %3161 = vmatmul.mubr.msk.f32.vlgmr.msra.gmra.mrb[16].mxu1 %vm72_vm0, %v3860_v24  ;;  %3183 = vmatmul.mubr.msk.f32.vlgmr.msra.gmra.mrb[12].mxu0 %vm72_vm0, %v3860_v24 }
 0xcbb   :  { %3333 = vmatpush3.bf16.msra.mxu1 %v3330_v54  ;;  %3171 = vmatprep.mubr.msk.f32.mxu1 %vm72_vm0, %v3858_v23 }
 0xcbc   :  { %3335 = vmatprep.subr.bf16.mxu1 %v3334_v25  ;;  %3197 = vmatprep.mubr.msk.f32.mxu0 %vm3468_vm1, %v3467_v48 }
 0xcbf   :  { %3337 = vmatpush3.bf16.msra.mxu1 %v3334_v25 }
 0xcc0   :  { %3185 = vmatprep.subr.mxu1 %v3467_v48 }
 0xcc2   :  { %3172 = vmatmul.mubr.msk.f32.vlgmr.msra.gmra.mrb[18].mxu1 %vm72_vm0, %v3860_v24 }
 0xcc3   :  { %3187 = vmatprep.mubr.msk.f32.mxu1 %vm3468_vm1, %v3467_v48 }
 0xd8d   :  { %v3162_v27 = vpop.f32.mrb[16].mxu1  ;;  %v3184_v28 = vpop.f32.mrb[12].mxu0 }
 0xd8e   :  { %v1587_v29 = vpop.f32.mrb[17].mxu1  ;;  %v1749_v30 = vpop.f32.mrb[13].mxu0  ;;  %v1593_v37 = vadd.f32 %v3162_v27, %v2892_v35  ;;  %v3899_v38 = vadd.f32 %v3184_v28, %v2898_v26 }
 0xd8f   :  { %v3882_v31 = vadd.f32 %v2898_v26, %v1749_v30  ;;  %v1588_v46 = vadd.f32 %v2892_v35, %v1587_v29 }
 0xd91   :  { %3196 = vmatpush3.msra.mxu0 %v3882_v31 }
 0xd92   :  { %3205 = vmatprep.subr.mxu0 %v3467_v48 }
 0xd95   :  { %v3173_v33 = vpop.f32.mrb[18].mxu1 }
 0xd96   :  { %v1668_v34 = vpop.f32.mrb[19].mxu1  ;;  %v1674_v41 = vadd.f32 %v3173_v33, %v2895_v32 }
 0xd97   :  { %v1669_v36 = vadd.f32 %v2895_v32, %v1668_v34 }
 0xd99   :  { %3186 = vmatpush3.xpose.msk.msra.mxu1 %vm403_vm2, %v1669_v36 }
 0xd9a   :  { %3190 = vmatprep.subr.mxu1 %v3467_v48 }
 0xd9c   :  { %3188 = vmatmul.mubr.msk.f32.vlgmr.msra.gmra.mrb[20].mxu1 %vm403_vm2, %v1588_v46 }
 0xd9d   :  { %3191 = vmatpush3.xpose.msk.msra.mxu1 %vm403_vm2, %v1674_v41  ;;  %3192 = vmatprep.mubr.msk.f32.mxu1 %vm3468_vm1, %v3467_v48 }
 0xd9e   :  { %3200 = vmatprep.subr.mxu1 %v3467_v48 }
 0xda0   :  { %3193 = vmatmul.mubr.msk.f32.vlgmr.msra.gmra.mrb[22].mxu1 %vm403_vm2, %v1593_v37 }
 0xda1   :  { %3201 = vmatpush3.msra.mxu1 %v3899_v38  ;;  %3202 = vmatprep.mubr.msk.f32.mxu1 %vm3468_vm1, %v3467_v48 }
 0xda2   :  { %3210 = vmatprep.subr.mxu1 %v3467_v48 }
 0xe6f   :  { %v1830_v39 = vpop.f32.mrb[20].mxu1 }
 0xe70   :  { %v1910_v40 = vmul.f32 0.25, %v1830_v39  ;;  %v3189_v42 = vpop.f32.mrb[21].mxu1 }
 0xe72   :  { %v1912_v43 = vadd.f32 %v3681_v1, %v1910_v40  ;;  %v2869_v40 = vld [vmem:[%s4061_s10 + $0x20] sm:$0xff] }
 0xe73   :  { %v1906_v44 = vpop.f32.mrb[22].mxu1 }
 0xe74   :  { %v1911_v45 = vmul.f32 0.25, %v1906_v44  ;;  %v3194_v47 = vpop.f32.mrb[23].mxu1  ;;  %v1914_v49 = vsel %vm572_vm3, %v1912_v43, -inf  ;;  %v2872_v44 = vld [vmem:[%s4061_s10 + $0x38] sm:$0xff] }
 0xe75   :  { %1915 = vmax.xlane.f32.xlu0 %v1914_v49 }
 0xe76   :  { %v1913_v50 = vadd.f32 %v3687_v6, %v1911_v45 }
 0xe78   :  { %v1917_v51 = vsel %vm572_vm3, %v1913_v50, -inf }
 0xe79   :  { %1918 = vmax.xlane.f32.xlu1 %v1917_v51 }
 0xe8a   :  { %2162 = vrot.lane.b32.xlu1 %v1674_v41, %s3469_s2 }
 0xe8e   :  { %2082 = vrot.lane.b32.xlu1 %v1588_v46, %s3469_s2 }
 0xf02   :  { %v1916_v52 = vpop.xlane.xlu0 %1915 }
 0xf03   :  { %v1920_v53 = vsub.f32 %v1912_v43, %v1916_v52  ;;  %v2871_v43 = vld [vmem:[%s4061_s10 + $0x30] sm:$0xff] }
 0xf04   :  { %v3350_v45 = vpack.c.bf16 %v2872_v44, %v2871_v43  ;;  %v2918_v43 = vld [vmem:[%s4066_s15 + $0x1] ss:$0 sm:$0xff] }
 0xf05   :  { %v1922_v55 = vmul.f32 1.442695, %v1920_v53 }
 0xf06   :  { %v1919_v56 = vpop.xlane.xlu1 %1918 }
 0xf07   :  { %3415 = vpow2.f32 %v1922_v55  ;;  %v1921_v57 = vsub.f32 %v1913_v50, %v1919_v56 }
 0xf09   :  { %v1924_v58 = vmul.f32 1.442695, %v1921_v57  ;;  %v2913_v57 = vld [vmem:[%s4062_s11 + $0x1] ss:$0 sm:$0xff] }
 0xf0a   :  { %v2163_v63 = vpop.permute.xlu1 %2162 }
 0xf0b   :  { %3417 = vpow2.f32 %v1924_v58 }
 0xf0e   :  { %v2083_v0 = vpop.permute.xlu1 %2082 }
 0xf11   :  { %v3416_v59 = vpop.eup %3415 }
 0xf12   :  { %v1926_v60 = vsel %vm572_vm3, %v3416_v59, 0.0 }
 0xf13   :  { %1927 = vadd.xlane.f32.xlu0 %v1926_v60 }
 0xf15   :  { %v3418_v61 = vpop.eup %3417 }
 0xf16   :  { %v1929_v62 = vsel %vm572_vm3, %v3418_v61, 0.0 }
 0xf17   :  { %1930 = vadd.xlane.f32.xlu1 %v1929_v62 }
 0xf28   :  { %2160 = vrot.lane.b32.xlu1 %v1593_v37, %s3469_s2 }
 0xf29   :  { %2084 = vrot.lane.b32.xlu0 %v1669_v36, %s3469_s2 }
 0xfa0   :  { %v1928_v2 = vpop.xlane.xlu0 %1927 }
 0xfa1   :  { %3419 = vrcp.f32 %v1928_v2 }
 0xfa4   :  { %v1931_v3 = vpop.xlane.xlu1 %1930  ;;  %v2085_v54 = vpop.permute.xlu0 %2084 }
 0xfa5   :  { %3421 = vrcp.f32 %v1931_v3 }
 0xfa8   :  { %v2161_v9 = vpop.permute.xlu1 %2160 }
 0xfab   :  { %v3420_v4 = vpop.eup %3419 }
 0xfac   :  { %v1934_v5 = vmul.f32 %v3420_v4, %v3416_v59 }
 0xfae   :  { %3198 = vmatmul.mubr.msk.f32.vlgmr.msra.gmra.mrb[14].mxu0 %vm572_vm3, %v1934_v5 }
 0xfaf   :  { %v3422_v7 = vpop.eup %3421  ;;  %3206 = vmatpush3.xpose.msk.msra.mxu0 %vm403_vm2, %v2085_v54  ;;  %3207 = vmatprep.mubr.msk.f32.mxu0 %vm3468_vm1, %v3467_v48 }
 0xfb0   :  { %v1935_v8 = vmul.f32 %v3422_v7, %v3418_v61  ;;  %3215 = vmatprep.subr.mxu0 %v3467_v48 }
 0xfb2   :  { %3203 = vmatmul.mubr.msk.f32.vlgmr.msra.gmra.mrb[24].mxu1 %vm572_vm3, %v1935_v8  ;;  %3208 = vmatmul.mubr.msk.f32.vlgmr.msra.gmra.mrb[16].mxu0 %vm403_vm2, %v2083_v0 }
 0xfb3   :  { %3211 = vmatpush3.xpose.msk.msra.mxu1 %vm403_vm2, %v2163_v63  ;;  %3212 = vmatprep.mubr.msk.f32.mxu1 %vm3468_vm1, %v3467_v48 }
 0xfb4   :  { %3220 = vmatprep.subr.mxu1 %v3467_v48  ;;  %3217 = vmatprep.mubr.msk.f32.mxu0 %vm3468_vm1, %v3467_v48 }
 0xfb6   :  { %3213 = vmatmul.mubr.msk.f32.vlgmr.msra.gmra.mrb[26].mxu1 %vm403_vm2, %v2161_v9 }
 0xfb7   :  { %3222 = vmatprep.mubr.msk.f32.mxu1 %vm3468_vm1, %v3467_v48 }
0x1081   :  { %v3932_v10 = vpop.f32.mrb[14].mxu0 }
0x1082   :  { %v3199_v11 = vpop.f32.mrb[15].mxu0 }
0x1085   :  { %v3934_v12 = vpop.f32.mrb[24].mxu1  ;;  %v2156_v13 = vpop.f32.mrb[16].mxu0 }
0x1086   :  { %v2238_v14 = vmul.f32 0.25, %v2156_v13  ;;  %v3204_v15 = vpop.f32.mrb[25].mxu1  ;;  %v3209_v16 = vpop.f32.mrb[17].mxu0 }
0x1087   :  { %v2879_v15 = vld [vmem:[%s4065_s14 + $0x38] sm:$0xff] }
0x1088   :  { %v2240_v17 = vadd.f32 %v3681_v1, %v2238_v14  ;;  %v2878_v14 = vld [vmem:[%s4065_s14 + $0x30] sm:$0xff] }
0x1089   :  { %v2234_v18 = vpop.f32.mrb[26].mxu1  ;;  %v3358_v16 = vpack.c.bf16 %v2879_v15, %v2878_v14 }
0x108a   :  { %v2239_v19 = vmul.f32 0.25, %v2234_v18  ;;  %v3214_v20 = vpop.f32.mrb[27].mxu1  ;;  %v2242_v21 = vsel %vm572_vm3, %v2240_v17, -inf }
0x108b   :  { %2243 = vmax.xlane.f32.xlu0 %v2242_v21 }
0x108c   :  { %v2241_v22 = vadd.f32 %v3687_v6, %v2239_v19 }
0x108e   :  { %v2245_v48 = vsel %vm572_vm3, %v2241_v22, -inf }
0x108f   :  { %2246 = vmax.xlane.f32.xlu1 %v2245_v48 }
0x10a0   :  { %2342 = vrot.lane.b32.xlu1 %v3899_v38, %s3469_s2 }
0x1118   :  { %v2244_v25 = vpop.xlane.xlu0 %2243 }
0x1119   :  { %v2248_v26 = vsub.f32 %v2240_v17, %v2244_v25  ;;  %v2916_v25 = vld [vmem:[%s4063_s12 + $0x1] ss:$0 sm:$0xff] }
0x111b   :  { %v2250_v27 = vmul.f32 1.442695, %v2248_v26 }
0x111c   :  { %v2247_v28 = vpop.xlane.xlu1 %2246 }
0x111d   :  { %3423 = vpow2.f32 %v2250_v27  ;;  %v2249_v1 = vsub.f32 %v2241_v22, %v2247_v28  ;;  %v2917_v27 = vld [vmem:[%s4064_s13 + $0x1] ss:$0 sm:$0xff] }
0x111f   :  { %v2252_v29 = vmul.f32 1.442695, %v2249_v1 }
0x1120   :  { %v2343_v30 = vpop.permute.xlu1 %2342 }
0x1121   :  { %3425 = vpow2.f32 %v2252_v29  ;;  %3221 = vmatpush3.msra.mxu1 %v2343_v30 }
0x1127   :  { %v3424_v32 = vpop.eup %3423 }
0x1128   :  { %v2254_v33 = vsel %vm572_vm3, %v3424_v32, 0.0 }
0x1129   :  { %2255 = vadd.xlane.f32.xlu0 %v2254_v33 }
0x112b   :  { %v3426_v6 = vpop.eup %3425 }
0x112c   :  { %v2257_v34 = vsel %vm572_vm3, %v3426_v6, 0.0 }
0x112d   :  { %2258 = vadd.xlane.f32.xlu0 %v2257_v34  ;;  %v2882_v34 = vld [vmem:[%s4067_s16 + $0x48] sm:$0xff] }
0x1143   :  { %2265 = vrot.lane.b32.xlu0 %v3882_v31, %s3469_s2  ;;  %v2870_v31 = vld [vmem:[%s4061_s10 + $0x28] sm:$0xff] }
0x1144   :  { %v3346_v42 = vpack.c.bf16 %v2870_v31, %v2869_v40  ;;  %v2887_v40 = vld [vmem:[%s4067_s16 + $0x70] sm:$0xff]  ;;  %v2888_v31 = vld [vmem:[%s4067_s16 + $0x78] sm:$0xff] }
0x11b6   :  { %v2256_v35 = vpop.xlane.xlu0 %2255 }
0x11b7   :  { %3427 = vrcp.f32 %v2256_v35 }
0x11ba   :  { %v2259_v36 = vpop.xlane.xlu0 %2258 }
0x11bb   :  { %3429 = vrcp.f32 %v2259_v36  ;;  %v2883_v36 = vld [vmem:[%s4067_s16 + $0x50] sm:$0xff] }
0x11be   :  { %v2266_v46 = vpop.permute.xlu0 %2265 }
0x11bf   :  { %3216 = vmatpush3.msra.mxu0 %v2266_v46  ;;  %v2884_v46 = vld [vmem:[%s4067_s16 + $0x58] sm:$0xff] }
0x11c0   :  { %3347 = vmatprep.subr.bf16.mxu0 %v3346_v42 }
0x11c1   :  { %v3428_v41 = vpop.eup %3427 }
0x11c2   :  { %v2262_v37 = vmul.f32 %v3428_v41, %v3424_v32  ;;  %v3366_v41 = vpack.c.bf16 %v2884_v46, %v2883_v36 }
0x11c4   :  { %3218 = vmatmul.mubr.msk.f32.vlgmr.msra.gmra.mrb[18].mxu0 %vm572_vm3, %v2262_v37  ;;  %v2885_v37 = vld [vmem:[%s4067_s16 + $0x60] sm:$0xff] }
0x11c5   :  { %v3430_v38 = vpop.eup %3429  ;;  %3349 = vmatpush3.bf16.msra.mxu0 %v3346_v42  ;;  %v3374_v42 = vpack.c.bf16 %v2888_v31, %v2887_v40 }
0x11c6   :  { %v2263_v39 = vmul.f32 %v3430_v38, %v3426_v6  ;;  %3351 = vmatprep.subr.bf16.mxu0 %v3350_v45  ;;  %v2881_v6 = vld [vmem:[%s4067_s16 + $0x40] sm:$0xff]  ;;  %v2886_v38 = vld [vmem:[%s4067_s16 + $0x68] sm:$0xff] }
0x11c7   :  { %v3362_v35 = vpack.c.bf16 %v2882_v34, %v2881_v6  ;;  %v2925_v6 = vld [vmem:[%s4070_s19 + $0x1] ss:$0 sm:$0xff] }
0x11c8   :  { %3223 = vmatmul.mubr.msk.f32.vlgmr.msra.gmra.mrb[28].mxu1 %vm572_vm3, %v2263_v39  ;;  %v3370_v39 = vpack.c.bf16 %v2886_v38, %v2885_v37 }
0x11c9   :  { %3353 = vmatpush3.bf16.msra.mxu0 %v3350_v45 }
0x11ca   :  { %3363 = vmatprep.subr.bf16.mxu0 %v3362_v35 }
0x1297   :  { %v2337_v47 = vpop.f32.mrb[18].mxu0 }
0x1298   :  { %2420 = vrot.lane.b32.xlu1 %v2337_v47, %s3470_s21  ;;  %v3219_v49 = vpop.f32.mrb[19].mxu0 }
0x129b   :  { %v2414_v50 = vpop.f32.mrb[28].mxu1 }
0x129c   :  { %2422 = vrot.lane.b32.xlu1 %v2414_v50, %s3470_s21  ;;  %v3224_v51 = vpop.f32.mrb[29].mxu1 }
0x130a   :  { %v2421_v52 = vpop.permute.xlu1 %2420 }
0x130b   :  { %v2426_v53 = vsel %vm403_vm2, %v3932_v10, %v2421_v52 }
0x130c   :  { %3233 = vmatprep.mubr.msk.f32.mxu0 %vm72_vm0, %v2426_v53 }
0x130e   :  { %v2423_v55 = vpop.permute.xlu1 %2422 }
0x130f   :  { %v2427_v56 = vsel %vm403_vm2, %v3934_v12, %v2423_v55  ;;  %v2877_v12 = vld [vmem:[%s4065_s14 + $0x28] sm:$0xff] }
0x1310   :  { %3234 = vmatmul.mubr.msk.f32.vlgmr.msra.gmra.mrb[20].mxu0 %vm72_vm0, %v2427_v56 }
0x1311   :  { %3365 = vmatpush3.bf16.msra.mxu0 %v3362_v35 }
0x1312   :  { %3367 = vmatprep.subr.bf16.mxu0 %v3366_v41 }
0x1315   :  { %3369 = vmatpush3.bf16.msra.mxu0 %v3366_v41 }
0x1316   :  { %3371 = vmatprep.subr.bf16.mxu0 %v3370_v39 }
0x1319   :  { %3373 = vmatpush3.bf16.msra.mxu0 %v3370_v39 }
0x131a   :  { %3375 = vmatprep.subr.bf16.mxu0 %v3374_v42 }
0x131d   :  { %3377 = vmatpush3.bf16.msra.mxu0 %v3374_v42 }
0x13e3   :  { %v3235_v58 = vpop.f32.mrb[20].mxu0 }
0x13e4   :  { %v2512_v59 = vadd.f32 %v3235_v58, %v2913_v57  ;;  %v2506_v60 = vpop.f32.mrb[21].mxu0 }
0x13e5   :  { %v2507_v61 = vadd.f32 %v2913_v57, %v2506_v60 }
0x13e6   :  { %v2516_v62 = vadd.f32 %v2512_v59, %v3860_v24 }
0x13e7   :  { %v2515_v63 = vadd.f32 %v2507_v61, %v3858_v23  ;;  %v2876_v23 = vld [vmem:[%s4065_s14 + $0x20] sm:$0xff] }
0x13e8   :  { %v2520_v0 = vsel %vm72_vm0, %v2516_v62, 0.0  ;;  %v3354_v13 = vpack.c.bf16 %v2877_v12, %v2876_v23 }
0x13e9   :  { %2521 = vadd.xlane.f32.xlu1 %v2520_v0  ;;  %v2517_v2 = vsel %vm72_vm0, %v2515_v63, 0.0 }
0x13ea   :  { %2518 = vadd.xlane.f32.xlu0 %v2517_v2  ;;  %3355 = vmatprep.subr.bf16.mxu1 %v3354_v13 }
0x13eb   :  { %3357 = vmatpush3.bf16.msra.mxu1 %v3354_v13 }
0x13ec   :  { %3359 = vmatprep.subr.bf16.mxu1 %v3358_v16 }
0x13ef   :  { %3361 = vmatpush3.bf16.msra.mxu1 %v3358_v16 }
0x1476   :  { %v2522_v3 = vpop.xlane.xlu1 %2521 }
0x1477   :  { %v2524_v4 = vmul.f32 0.03125, %v2522_v3  ;;  %v2519_v5 = vpop.xlane.xlu0 %2518 }
0x1478   :  { %v2523_v54 = vmul.f32 0.03125, %v2519_v5 }
0x1479   :  { %v2526_v7 = vsub.f32 %v2516_v62, %v2524_v4 }
0x147a   :  { %v2525_v8 = vsub.f32 %v2515_v63, %v2523_v54  ;;  %v2921_v54 = vld [vmem:[%s4068_s17 + $0x1] ss:$0 sm:$0xff] }
0x147b   :  { %v2528_v11 = vmul.f32 %v2526_v7, %v2526_v7 }
0x147c   :  { %v2527_v9 = vmul.f32 %v2525_v8, %v2525_v8 }
0x147d   :  { %v2532_v24 = vsel %vm72_vm0, %v2528_v11, 0.0 }
0x147e   :  { %v2529_v10 = vsel %vm72_vm0, %v2527_v9, 0.0 }
0x147f   :  { %2530 = vadd.xlane.f32.xlu0 %v2529_v10 }
0x1483   :  { %2533 = vadd.xlane.f32.xlu0 %v2532_v24 }
0x150c   :  { %v2531_v17 = vpop.xlane.xlu0 %2530 }
0x150d   :  { %v2535_v18 = vmul.f32 0.03125, %v2531_v17 }
0x150f   :  { %v2537_v19 = vadd.f32 1e-05, %v2535_v18 }
0x1510   :  { %v2534_v20 = vpop.xlane.xlu0 %2533 }
0x1511   :  { %3431 = vrsqrt.f32 %v2537_v19  ;;  %v2536_v21 = vmul.f32 0.03125, %v2534_v20 }
0x1513   :  { %v2538_v22 = vadd.f32 1e-05, %v2536_v21 }
0x1515   :  { %3433 = vrsqrt.f32 %v2538_v22 }
0x151b   :  { %v3432_v48 = vpop.eup %3431 }
0x151c   :  { %v2541_v26 = vmul.f32 %v3432_v48, %v2525_v8 }
0x151e   :  { %v2549_v28 = vmul.f32 %v2916_v25, %v2541_v26 }
0x151f   :  { %v3434_v1 = vpop.eup %3433 }
0x1520   :  { %v2542_v29 = vmul.f32 %v3434_v1, %v2526_v7  ;;  %v2557_v30 = vadd.f32 %v2917_v27, %v2549_v28 }
0x1522   :  { %v2550_v32 = vmul.f32 %v2916_v25, %v2542_v29  ;;  %3244 = vmatprep.mubr.msk.f32.mxu1 %vm72_vm0, %v2557_v30 }
0x1524   :  { %v2558_v33 = vadd.f32 %v2917_v27, %v2550_v32 }
0x1526   :  { %3245 = vmatmul.mubr.msk.f32.vlgmr.msra.gmra.mrb[30].mxu1 %vm72_vm0, %v2558_v33 }
0x15f9   :  { %v3246_v44 = vpop.f32.mrb[30].mxu1 }
0x15fa   :  { %v2643_v45 = vadd.f32 %v3246_v44, %v2918_v43  ;;  %v2637_v47 = vpop.f32.mrb[31].mxu1 }
0x15fb   :  { %v2638_v49 = vadd.f32 %v2918_v43, %v2637_v47 }
0x15fc   :  { %v2649_v50 = vmul.f32 0.044715, %v2643_v45  ;;  %v2647_v3 = vmul.f32 0.5, %v2643_v45 }
0x15fd   :  { %v2648_v51 = vmul.f32 0.044715, %v2638_v49  ;;  %v2646_v0 = vmul.f32 0.5, %v2638_v49 }
0x15fe   :  { %v2651_v52 = vmul.f32 %v2649_v50, %v2643_v45 }
0x15ff   :  { %v2650_v53 = vmul.f32 %v2648_v51, %v2638_v49 }
0x1600   :  { %v2653_v55 = vmul.f32 %v2651_v52, %v2643_v45 }
0x1601   :  { %v2652_v56 = vmul.f32 %v2650_v53, %v2638_v49 }
0x1602   :  { %v2655_v57 = vadd.f32 %v2653_v55, %v2643_v45 }
0x1603   :  { %v2654_v58 = vadd.f32 %v2652_v56, %v2638_v49 }
0x1604   :  { %v2657_v59 = vmul.f32 0.7978846, %v2655_v57 }
0x1605   :  { %v2656_v60 = vmul.f32 0.7978846, %v2654_v58 }
0x1606   :  { %3435 = vtanh.f32 %v2657_v59 }
0x1607   :  { %3437 = vtanh.f32 %v2656_v60 }
0x1610   :  { %v3436_v61 = vpop.eup %3435 }
0x1611   :  { %v3438_v62 = vpop.eup %3437  ;;  %v2661_v63 = vadd.f32 1.0, %v3436_v61 }
0x1612   :  { %v2660_v2 = vadd.f32 1.0, %v3438_v62 }
0x1613   :  { %v2663_v5 = vmul.f32 %v2661_v63, %v2647_v3 }
0x1614   :  { %v2662_v4 = vmul.f32 %v2660_v2, %v2646_v0 }
0x1616   :  { %3263 = vmatprep.mubr.msk.f32.mxu0 %vm1329_vm4, %v2662_v4 }
0x1617   :  { %3264 = vmatmul.mubr.msk.f32.vlgmr.msra.gmra.mrb[22].mxu0 %vm1329_vm4, %v2663_v5 }
0x16ea   :  { %v3265_v7 = vpop.f32.mrb[22].mxu0 }
0x16eb   :  { %v2748_v8 = vadd.f32 %v3265_v7, %v2921_v54  ;;  %v2742_v9 = vpop.f32.mrb[23].mxu0 }
0x16ec   :  { %v2743_v10 = vadd.f32 %v2921_v54, %v2742_v9 }
0x16ed   :  { %v2752_v11 = vadd.f32 %v2748_v8, %v2558_v33 }
0x16ee   :  { %v2751_v24 = vadd.f32 %v2743_v10, %v2557_v30  ;;  %v2924_v30 = vld [vmem:[%s4069_s18 + $0x1] ss:$0 sm:$0xff]  ;;  %s3443_s18 = scalar_lea.vmem %s2809_s23, 32 }
0x16ef   :  { %v2756_v23 = vsel %vm72_vm0, %v2752_v11, 0.0  ;;  %p3444_p0 = scmp.ne.s32.totalorder %s2809_s23, %s3443_s18  ;;  %p3449_p2 = scmp.lt.s32.totalorder %s3443_s18, %s3443_s18 }
0x16f0   :  { %2757 = vadd.xlane.f32.xlu0 %v2756_v23  ;;  %v2753_v12 = vsel %vm72_vm0, %v2751_v24, 0.0 }
0x16f1   :  { %2754 = vadd.xlane.f32.xlu1 %v2753_v12  ;;  %p3450_p3 = por %p3449_p2, %p3448_p1 }
0x16f3   :  { %p3451_p4 = pnand %p3450_p3, %p3444_p0 }
0x177d   :  { %v2758_v13 = vpop.xlane.xlu0 %2757 }
0x177e   :  { %v2760_v14 = vmul.f32 0.03125, %v2758_v13  ;;  %v2755_v15 = vpop.xlane.xlu1 %2754 }
0x177f   :  { %v2759_v16 = vmul.f32 0.03125, %v2755_v15 }
0x1780   :  { %v2762_v17 = vsub.f32 %v2752_v11, %v2760_v14 }
0x1781   :  { %v2761_v18 = vsub.f32 %v2751_v24, %v2759_v16 }
0x1782   :  { %v2764_v19 = vmul.f32 %v2762_v17, %v2762_v17 }
0x1783   :  { %v2763_v20 = vmul.f32 %v2761_v18, %v2761_v18 }
0x1784   :  { %v2768_v21 = vsel %vm72_vm0, %v2764_v19, 0.0 }
0x1785   :  { %2769 = vadd.xlane.f32.xlu0 %v2768_v21  ;;  %v2765_v22 = vsel %vm72_vm0, %v2763_v20, 0.0 }
0x1786   :  { %2766 = vadd.xlane.f32.xlu1 %v2765_v22 }
0x1812   :  { %v2770_v48 = vpop.xlane.xlu0 %2769 }
0x1813   :  { %v2772_v25 = vmul.f32 0.03125, %v2770_v48  ;;  %v2767_v26 = vpop.xlane.xlu1 %2766 }
0x1814   :  { %v2771_v27 = vmul.f32 0.03125, %v2767_v26 }
0x1815   :  { %v2774_v28 = vadd.f32 1e-05, %v2772_v25 }
0x1816   :  { %v2773_v1 = vadd.f32 1e-05, %v2771_v27 }
0x1817   :  { %3439 = vrsqrt.f32 %v2774_v28 }
0x1818   :  { %3441 = vrsqrt.f32 %v2773_v1 }
0x1821   :  { %v3440_v29 = vpop.eup %3439 }
0x1822   :  { %v3442_v32 = vpop.eup %3441  ;;  %v2778_v33 = vmul.f32 %v3440_v29, %v2762_v17 }
0x1823   :  { %v2777_v34 = vmul.f32 %v3442_v32, %v2761_v18 }
0x1824   :  { %v2786_v35 = vmul.f32 %v2924_v30, %v2778_v33 }
0x1825   :  { %v2785_v36 = vmul.f32 %v2924_v30, %v2777_v34 }
0x1826   :  { %v2794_v46 = vadd.f32 %v2925_v6, %v2786_v35 }
0x1827   :  { %v2793_v41 = vadd.f32 %v2925_v6, %v2785_v36 }
0x1828   :  { %v2796_v37 = vrot.slane %v2794_v46, 7 }
0x182a   :  { %v2799_v38 = vsel %vm2798_vm5, %v2793_v41, %v2796_v37 }
0x182b   :  { %2801 = vst.msk [vmem:[#allocation2] sm:$0x3] %vm2800_vm6, %v2799_v38 }
0x182c   :  { %3454 = shalt.err (!%p3451_p4)
}
0x182d   :  { %s3455_s26 = scalar_lea.hbm %s4071_s20, 32 }
0x182e   :  { %p3456_p5 = scmp.ne.s32.totalorder %s4071_s20, %s3455_s26  ;;  %p3459_p6 = scmp.lt.u32.totalorder %s3455_s26, %s4071_s20 }
0x1830   :  { %p3461_p7 = pnand %p3459_p6, %p3456_p5 }
0x1832   :  { %3464 = shalt.err (!%p3461_p7)
}
0x1833   :  { %2811 = dma.vmem_to_hbm [thread:$0]  %s2809_s23, 32, %s4071_s20, [#allocation3]  }
0x1834   :  { %3465 = dma.done.wait [#allocation3], 32  }
0x1835   :  { %3466 = vsyncadd [#allocation3], 4294967264 }
0x1836   :  { %2815 = vsyncpa [#allocation3], 1 }

</bundles_post_ra>
